<compile_context>
chip_gen: v7x
topology: tpu7x:2x2x1
jax: 0.10.0
libtpu: 0.0.40
codegen_flags: <defaults>
</compile_context>

<pallas_src>
import jax
import jax.numpy as jnp
from jax import lax
from jax.experimental import pallas as pl
from jax.experimental.pallas import tpu as pltpu


_C0 = 16  # bf16-vreg-aligned (16 sublanes) column where the conv2 interior starts


def _round_up(x, m):
    return (x + m - 1) // m * m


def _vmem_limit_bytes():
    """Per-generation VMEM budget with headroom (v7x only has 64 MiB / TC)."""
    cap = 64 * 1024 * 1024
    try:
        info = pltpu.get_tpu_info()
        cap = int(getattr(info, "vmem_capacity_bytes", cap) or cap)
    except Exception:
        pass
    return int(min(cap * 3 // 4, 100 * 1024 * 1024))


def _choose_b_blk(N, H, W, Cp, Pp, vmem_limit):
    """Batch fusion: ~2048 matmul rows per step, grid >= 2, VMEM-bounded."""
    target = max(1, 2048 // (H * W))
    grid_cap = max(1, N // 2)           # keep >= 2 grid steps for v7x megacore
    cap = max(1, min(N, target, grid_cap))
    w_tot = _round_up(_C0 + W + 1, 16)

    def est_bytes(b):
        m = b * H * W
        io = 2 * 2 * (b * H * W * Cp * 2)          # dbl-buffered in+out (bf16)
        pad = b * (H + 2) * w_tot * Pp * 2         # halo scratch (bf16)
        inter = 10 * m * Pp * 4                    # f32 intermediates / slabs
        return io + pad + inter

    for cand in range(cap, 0, -1):
        if N % cand == 0 and est_bytes(cand) <= int(vmem_limit * 0.6):
            return cand
    return 1


# ----------------------------------------------------------------------------
# kernel
# ----------------------------------------------------------------------------
def bottleneck_kernel(x_ref, w1_ref, b1_ref, w2_ref, b2_ref, w3_ref, b3_ref,
                      o_ref, pad_ref):
    # x_ref  : (B, H, W, Cp)  bf16   (channels zero-padded to lane width)
    # w1_ref : (Cp, Pp) bf16, BN1 scale folded;    b1_ref: (1, Pp) f32
    # w2_ref : (3, 3*Pp, Pp) bf16, BN2 folded, the 3 dx taps fused along K;
    #          b2_ref: (1, Pp) f32
    # w3_ref : (Pp, Cp) bf16, BN3 folded;          b3_ref: (1, Cp) f32
    # pad_ref: (B, H+2, W_TOT, Pp) bf16 scratch (zero halo + aligned interior)
    B, H, W, Cp = x_ref.shape
    Pp = w1_ref.shape[-1]
    M = B * H * W
    c0 = _C0

    x = x_ref[...]                                      # (B,H,W,Cp) bf16
    x_flat = x.reshape(M, Cp)

    # ---- conv1 (1x1, BN folded) + bias + relu -------------------------------
    h1 = jnp.dot(x_flat, w1_ref[...], preferred_element_type=jnp.float32)
    h1 = jnp.maximum(h1 + b1_ref[...], 0.0)             # (M, Pp) f32
    h1b = h1.astype(jnp.bfloat16).reshape(B, H, W, Pp)

    # ---- stage h1 into the zero-halo scratch --------------------------------
    # zero only the 1-element halo ring the taps read (kept per-step so it is
    # correct on every core under "parallel" grid semantics).
    zrow = jnp.zeros((B, 1, W + 2, Pp), jnp.bfloat16)
    pad_ref[:, 0:1, c0 - 1:c0 + W + 1, :] = zrow
    pad_ref[:, H + 1:H + 2, c0 - 1:c0 + W + 1, :] = zrow
    zcol = jnp.zeros((B, H, 1, Pp), jnp.bfloat16)
    pad_ref[:, 1:H + 1, c0 - 1:c0, :] = zcol
    pad_ref[:, 1:H + 1, c0 + W:c0 + W + 1, :] = zcol
    # interior store is bf16-vreg aligned (c0 = 16)
    pad_ref[:, 1:H + 1, c0:c0 + W, :] = h1b

    # ---- conv2 (3x3, stride=1, pad=1) ---------------------------------------
    # Build the three dx-shifted slabs once (full height, incl. halo rows) and
    # fuse them along K; dy slicing of the slabs is a free address offset.
    left = pad_ref[:, :, c0 - 1:c0 - 1 + W, :]           # (B,H+2,W,Pp)
    center = pad_ref[:, :, c0:c0 + W, :]
    right = pad_ref[:, :, c0 + 1:c0 + 1 + W, :]
    slabs = jnp.concatenate([left, center, right], axis=-1)  # (B,H+2,W,3*Pp)

    acc = jnp.zeros((M, Pp), jnp.float32)
    for dy in range(3):
        tap = slabs[:, dy:dy + H, :, :].reshape(M, 3 * Pp)
        acc = acc + jnp.dot(tap, w2_ref[dy],
                            preferred_element_type=jnp.float32)
    h2 = jnp.maximum(acc + b2_ref[...], 0.0).astype(jnp.bfloat16)   # (M, Pp)

    # ---- conv3 (1x1, BN folded) + bias + identity residual + relu -----------
    h3 = jnp.dot(h2, w3_ref[...], preferred_element_type=jnp.float32)
    h3 = h3 + b3_ref[...] + x_flat.astype(jnp.float32)
    out = jnp.maximum(h3, 0.0)                                       # (M, Cp)

    o_ref[...] = out.reshape(B, H, W, Cp).astype(o_ref.dtype)


# ----------------------------------------------------------------------------
# wrapper
# ----------------------------------------------------------------------------
def bottleneck_pallas_nhwc(x_nhwc, params, *, b_blk=None):
    """x_nhwc: (N, H, W, Cp) bf16 with channels zero-padded to Cp (lane-dense).
    Returns (N, H, W, Cp) bf16 (padded channels are zero)."""
    w1, b1, w2k, b2, w3, b3 = params
    N, H, W, Cp = x_nhwc.shape
    Pp = w1.shape[1]
    assert w1.shape[0] == Cp and w3.shape[1] == Cp, "identity residual layout"

    vmem_limit = _vmem_limit_bytes()
    if b_blk is None:
        b_blk = _choose_b_blk(N, H, W, Cp, Pp, vmem_limit)
    assert N % b_blk == 0
    grid_n = N // b_blk

    w_tot = _round_up(_C0 + W + 1, 16)

    def full(arr):
        return pl.BlockSpec(arr.shape, lambda n: (0,) * arr.ndim)

    flops = 2 * N * H * W * (Cp * Pp + 9 * Pp * Pp + Pp * Cp)
    param_bytes = sum(int(p.size) * p.dtype.itemsize for p in params)
    bytes_accessed = (int(x_nhwc.size) * 2          # bf16 input
                      + N * H * W * Cp * 2          # bf16 output
                      + param_bytes)
    cost = pl.CostEstimate(flops=int(flops), transcendentals=0,
                           bytes_accessed=int(bytes_accessed))

    return pl.pallas_call(
        bottleneck_kernel,
        out_shape=jax.ShapeDtypeStruct((N, H, W, Cp), jnp.bfloat16),
        grid_spec=pltpu.PrefetchScalarGridSpec(
            num_scalar_prefetch=0,
            grid=(grid_n,),
            in_specs=[
                pl.BlockSpec((b_blk, H, W, Cp), lambda n: (n, 0, 0, 0)),
                full(w1), full(b1), full(w2k), full(b2), full(w3), full(b3),
            ],
            out_specs=pl.BlockSpec((b_blk, H, W, Cp), lambda n: (n, 0, 0, 0)),
            scratch_shapes=[
                pltpu.VMEM((b_blk, H + 2, w_tot, Pp), jnp.bfloat16)],
        ),
        compiler_params=pltpu.CompilerParams(
            dimension_semantics=("parallel",),
            vmem_limit_bytes=vmem_limit),
        cost_estimate=cost,
    )(x_nhwc, w1, b1, w2k, b2, w3, b3)


def bottleneck_pallas(x_nchw, params, cp, cout):
    """PyTorch-layout adapter: (N, Cin, H, W) f32 -> (N, Cout, H, W) f32.
    TODO(synk): in a full NHWC model these transposes / channel pads would be
    eliminated by keeping activations NHWC + lane-padded end to end."""
    N, cin, H, W = x_nchw.shape
    x_nhwc = jnp.transpose(x_nchw, (0, 2, 3, 1)).astype(jnp.bfloat16)
    x_p = jnp.zeros((N, H, W, cp), jnp.bfloat16).at[..., :cin].set(x_nhwc)
    out_p = bottleneck_pallas_nhwc(x_p, params)
    return jnp.transpose(out_p[..., :cout], (0, 3, 1, 2)).astype(jnp.float32)


# ----------------------------------------------------------------------------
# parameter preparation: fold BN into weights, pad channels, cast to bf16
# ----------------------------------------------------------------------------
def fold_bn(gamma, beta, mean=None, var=None, eps=1e-5):
    mean = jnp.zeros_like(gamma) if mean is None else mean
    var = jnp.ones_like(gamma) if var is None else var
    scale = gamma / jnp.sqrt(var + eps)
    bias = beta - mean * scale
    return scale, bias


def prepare_params(w1_t, g1, be1, w2_t, g2, be2, w3_t, g3, be3,
                   *, eps=1e-5, lane=128):
    planes = w1_t.shape[0]
    inplanes = w1_t.shape[1]
    cout = w3_t.shape[0]
    Pp = _round_up(planes, lane)
    Cp = _round_up(max(inplanes, cout), lane)

    s1, b1 = fold_bn(g1, be1, eps=eps)
    s2, b2 = fold_bn(g2, be2, eps=eps)
    s3, b3 = fold_bn(g3, be3, eps=eps)

    # fold BN scale per output channel into the conv weights; matmul layout.
    w1 = jnp.transpose(w1_t[:, :, 0, 0] * s1[:, None], (1, 0))          # (Cin, P)
    w2 = jnp.transpose(w2_t * s2[:, None, None, None], (2, 3, 1, 0))    # (3,3,I,O)
    w3 = jnp.transpose(w3_t[:, :, 0, 0] * s3[:, None], (1, 0))          # (P, 4P)

    w1p = jnp.zeros((Cp, Pp), jnp.float32).at[:inplanes, :planes].set(w1)
    w2p = jnp.zeros((3, 3, Pp, Pp), jnp.float32).at[:, :, :planes, :planes].set(w2)
    w2k = w2p.reshape(3, 3 * Pp, Pp)    # fuse the 3 dx taps along K (K = 3*Pp)
    w3p = jnp.zeros((Pp, Cp), jnp.float32).at[:planes, :cout].set(w3)

    b1p = jnp.zeros((1, Pp), jnp.float32).at[0, :planes].set(b1)
    b2p = jnp.zeros((1, Pp), jnp.float32).at[0, :planes].set(b2)
    b3p = jnp.zeros((1, Cp), jnp.float32).at[0, :cout].set(b3)

    params = (w1p.astype(jnp.bfloat16), b1p,
              w2k.astype(jnp.bfloat16), b2p,
              w3p.astype(jnp.bfloat16), b3p)
    return params, (Cp, Pp, inplanes, cout)


# ----------------------------- reference (plain JAX, NCHW like PyTorch) -----
def bottleneck_reference(x, torch_params, eps=1e-5):
    (w1_t, g1, be1, w2_t, g2, be2, w3_t, g3, be3) = torch_params

    def conv(x, w, stride=1, pad=0):
        return lax.conv_general_dilated(
            x, w, window_strides=(stride, stride),
            padding=((pad, pad), (pad, pad)),
            dimension_numbers=('NCHW', 'OIHW', 'NCHW'),
            precision=lax.Precision.HIGHEST)

    def bn(x, gamma, beta):
        # eval-mode BN with running_mean=0, running_var=1
        scale = gamma / jnp.sqrt(1.0 + eps)
        return x * scale[None, :, None, None] + beta[None, :, None, None]

    out = jax.nn.relu(bn(conv(x, w1_t), g1, be1))
    out = jax.nn.relu(bn(conv(out, w2_t, stride=1, pad=1), g2, be2))
    out = bn(conv(out, w3_t), g3, be3)
    return jax.nn.relu(out + x)


if __name__ == "__main__":
    # small shapes consistent with the module: planes=8, inplanes=4*planes=32
    N, planes, H, W = 2, 8, 8, 8
    inplanes = planes * 4

    key = jax.random.PRNGKey(0)
    ks = jax.random.split(key, 10)

    # PyTorch-layout (OIHW) conv weights
    w1_t = jax.random.normal(ks[0], (planes, inplanes, 1, 1), jnp.float32) * 0.1
    w2_t = jax.random.normal(ks[1], (planes, planes, 3, 3), jnp.float32) * 0.1
    w3_t = jax.random.normal(ks[2], (planes * 4, planes, 1, 1), jnp.float32) * 0.1

    # BatchNorm affine params (running_mean=0, running_var=1)
    g1 = 1.0 + 0.1 * jax.random.normal(ks[3], (planes,), jnp.float32)
    be1 = 0.1 * jax.random.normal(ks[4], (planes,), jnp.float32)
    g2 = 1.0 + 0.1 * jax.random.normal(ks[5], (planes,), jnp.float32)
    be2 = 0.1 * jax.random.normal(ks[6], (planes,), jnp.float32)
    g3 = 1.0 + 0.1 * jax.random.normal(ks[7], (planes * 4,), jnp.float32)
    be3 = 0.1 * jax.random.normal(ks[8], (planes * 4,), jnp.float32)

    x = jax.random.normal(ks[9], (N, inplanes, H, W), jnp.float32)

    params, (Cp, Pp, _, cout) = prepare_params(
        w1_t, g1, be1, w2_t, g2, be2, w3_t, g3, be3)
    assert cout == inplanes, "identity residual requires inplanes == planes*4"

    out = bottleneck_pallas(x, params, Cp, cout)
    out = jax.block_until_ready(out)

    ref = bottleneck_reference(x, (w1_t, g1, be1, w2_t, g2, be2, w3_t, g3, be3))
    ref = jax.block_until_ready(ref)

    assert out.shape == (N, inplanes, H, W)
    # bf16 MXU operands + bf16 output vs f32 HIGHEST reference -> loose tol.
    max_err = float(jnp.max(jnp.abs(out - ref)))
    assert jnp.allclose(out, ref, rtol=6e-2, atol=8e-2), max_err

    print("KERNEL_OK")
</pallas_src>

<mosaic_0001>
module attributes {stable_mosaic.version = 11 : i64} {
  func.func @bottleneck_kernel(%arg0: i32, %arg1: memref<1x8x8x128xbf16, #tpu.memory_space<vmem>>, %arg2: memref<128x128xbf16, #tpu.memory_space<vmem>>, %arg3: memref<1x128xf32, #tpu.memory_space<vmem>>, %arg4: memref<3x384x128xbf16, #tpu.memory_space<vmem>>, %arg5: memref<1x128xf32, #tpu.memory_space<vmem>>, %arg6: memref<128x128xbf16, #tpu.memory_space<vmem>>, %arg7: memref<1x128xf32, #tpu.memory_space<vmem>>, %arg8: memref<1x8x8x128xbf16, #tpu.memory_space<vmem>>, %arg9: memref<1x10x32x128xbf16, #tpu.memory_space<vmem>>) attributes {dimension_semantics = [#tpu.dimension_semantics<parallel>], iteration_bounds = array<i64: 2>, scalar_prefetch = 0 : i64, scratch_operands = 1 : i64, tpu.core_type = #tpu.core_type<tc>, window_params = [{transform_indices = @transform_0, window_bounds = array<i64: 1, 8, 8, 128>}, {pipeline_mode = #tpu.pipeline_mode<synchronous>, transform_indices = @transform_1, window_bounds = array<i64: 128, 128>}, {pipeline_mode = #tpu.pipeline_mode<synchronous>, transform_indices = @transform_2, window_bounds = array<i64: 1, 128>}, {pipeline_mode = #tpu.pipeline_mode<synchronous>, transform_indices = @transform_3, window_bounds = array<i64: 3, 384, 128>}, {pipeline_mode = #tpu.pipeline_mode<synchronous>, transform_indices = @transform_4, window_bounds = array<i64: 1, 128>}, {pipeline_mode = #tpu.pipeline_mode<synchronous>, transform_indices = @transform_5, window_bounds = array<i64: 128, 128>}, {pipeline_mode = #tpu.pipeline_mode<synchronous>, transform_indices = @transform_6, window_bounds = array<i64: 1, 128>}, {transform_indices = @transform_7, window_bounds = array<i64: 1, 8, 8, 128>}]} {
    %c0 = arith.constant 0 : index
    %c0_0 = arith.constant 0 : index
    %c0_1 = arith.constant 0 : index
    %c0_2 = arith.constant 0 : index
    %0 = vector.load %arg1[%c0, %c0_0, %c0_1, %c0_2] : memref<1x8x8x128xbf16, #tpu.memory_space<vmem>>, vector<1x8x8x128xbf16>
    %1 = vector.shape_cast %0 : vector<1x8x8x128xbf16> to vector<64x128xbf16>
    %c0_3 = arith.constant 0 : index
    %c0_4 = arith.constant 0 : index
    %2 = vector.load %arg2[%c0_3, %c0_4] : memref<128x128xbf16, #tpu.memory_space<vmem>>, vector<128x128xbf16>
    %cst = arith.constant dense<0.000000e+00> : vector<64x128xf32>
    %3 = tpu.matmul %1, %2, %cst {dimension_numbers = #tpu.dot_dimension_numbers<[1], [0], [0], [1], [0, 0, 1, 1], [], []>} : vector<64x128xbf16>, vector<128x128xbf16>, vector<64x128xf32> -> vector<64x128xf32>
    %c0_5 = arith.constant 0 : index
    %c0_6 = arith.constant 0 : index
    %4 = vector.load %arg3[%c0_5, %c0_6] : memref<1x128xf32, #tpu.memory_space<vmem>>, vector<1x128xf32>
    %5 = vector.broadcast %4 : vector<1x128xf32> to vector<64x128xf32>
    %6 = arith.addf %3, %5 : vector<64x128xf32>
    %cst_7 = arith.constant 0.000000e+00 : f32
    %7 = vector.broadcast %cst_7 : f32 to vector<64x128xf32>
    %8 = arith.maximumf %6, %7 : vector<64x128xf32>
    %9 = arith.truncf %8 : vector<64x128xf32> to vector<64x128xbf16>
    %10 = vector.shape_cast %9 : vector<64x128xbf16> to vector<1x8x8x128xbf16>
    %cst_8 = arith.constant 0.000000e+00 : bf16
    %11 = vector.broadcast %cst_8 : bf16 to vector<1x1x10x128xbf16>
    %c0_9 = arith.constant 0 : index
    %c0_10 = arith.constant 0 : index
    %c15 = arith.constant 15 : index
    %c0_11 = arith.constant 0 : index
    %12 = vector.load %arg9[%c0_9, %c0_10, %c15, %c0_11] : memref<1x10x32x128xbf16, #tpu.memory_space<vmem>>, vector<1x1x10x128xbf16>
    tpu.vector_store %arg9[%c0_9, %c0_10, %c15, %c0_11], %11 {strides = array<i32>} : memref<1x10x32x128xbf16, #tpu.memory_space<vmem>>, vector<1x1x10x128xbf16>,
    %c0_12 = arith.constant 0 : index
    %c9 = arith.constant 9 : index
    %c15_13 = arith.constant 15 : index
    %c0_14 = arith.constant 0 : index
    %13 = vector.load %arg9[%c0_12, %c9, %c15_13, %c0_14] : memref<1x10x32x128xbf16, #tpu.memory_space<vmem>>, vector<1x1x10x128xbf16>
    tpu.vector_store %arg9[%c0_12, %c9, %c15_13, %c0_14], %11 {strides = array<i32>} : memref<1x10x32x128xbf16, #tpu.memory_space<vmem>>, vector<1x1x10x128xbf16>,
    %cst_15 = arith.constant 0.000000e+00 : bf16
    %14 = vector.broadcast %cst_15 : bf16 to vector<1x8x1x128xbf16>
    %c0_16 = arith.constant 0 : index
    %c1 = arith.constant 1 : index
    %c15_17 = arith.constant 15 : index
    %c0_18 = arith.constant 0 : index
    %15 = vector.load %arg9[%c0_16, %c1, %c15_17, %c0_18] : memref<1x10x32x128xbf16, #tpu.memory_space<vmem>>, vector<1x8x1x128xbf16>
    tpu.vector_store %arg9[%c0_16, %c1, %c15_17, %c0_18], %14 {strides = array<i32>} : memref<1x10x32x128xbf16, #tpu.memory_space<vmem>>, vector<1x8x1x128xbf16>,
    %c0_19 = arith.constant 0 : index
    %c1_20 = arith.constant 1 : index
    %c24 = arith.constant 24 : index
    %c0_21 = arith.constant 0 : index
    %16 = vector.load %arg9[%c0_19, %c1_20, %c24, %c0_21] : memref<1x10x32x128xbf16, #tpu.memory_space<vmem>>, vector<1x8x1x128xbf16>
    tpu.vector_store %arg9[%c0_19, %c1_20, %c24, %c0_21], %14 {strides = array<i32>} : memref<1x10x32x128xbf16, #tpu.memory_space<vmem>>, vector<1x8x1x128xbf16>,
    %c0_22 = arith.constant 0 : index
    %c1_23 = arith.constant 1 : index
    %c16 = arith.constant 16 : index
    %c0_24 = arith.constant 0 : index
    %17 = vector.load %arg9[%c0_22, %c1_23, %c16, %c0_24] : memref<1x10x32x128xbf16, #tpu.memory_space<vmem>>, vector<1x8x8x128xbf16>
    tpu.vector_store %arg9[%c0_22, %c1_23, %c16, %c0_24], %10 {strides = array<i32>} : memref<1x10x32x128xbf16, #tpu.memory_space<vmem>>, vector<1x8x8x128xbf16>,
    %c0_25 = arith.constant 0 : index
    %c0_26 = arith.constant 0 : index
    %c15_27 = arith.constant 15 : index
    %c0_28 = arith.constant 0 : index
    %18 = vector.load %arg9[%c0_25, %c0_26, %c15_27, %c0_28] : memref<1x10x32x128xbf16, #tpu.memory_space<vmem>>, vector<1x10x8x128xbf16>
    %c0_29 = arith.constant 0 : index
    %c0_30 = arith.constant 0 : index
    %c16_31 = arith.constant 16 : index
    %c0_32 = arith.constant 0 : index
    %19 = vector.load %arg9[%c0_29, %c0_30, %c16_31, %c0_32] : memref<1x10x32x128xbf16, #tpu.memory_space<vmem>>, vector<1x10x8x128xbf16>
    %c0_33 = arith.constant 0 : index
    %c0_34 = arith.constant 0 : index
    %c17 = arith.constant 17 : index
    %c0_35 = arith.constant 0 : index
    %20 = vector.load %arg9[%c0_33, %c0_34, %c17, %c0_35] : memref<1x10x32x128xbf16, #tpu.memory_space<vmem>>, vector<1x10x8x128xbf16>
    %21 = tpu.concatenate %18, %19, %20 in 3 : vector<1x10x8x128xbf16>, vector<1x10x8x128xbf16>, vector<1x10x8x128xbf16> -> vector<1x10x8x384xbf16>
    %cst_36 = arith.constant 0.000000e+00 : f32
    %22 = vector.broadcast %cst_36 : f32 to vector<64x128xf32>
    %23 = vector.extract_strided_slice %21 {offsets = [0, 0, 0, 0], sizes = [1, 8, 8, 384], strides = [1, 1, 1, 1]} : vector<1x10x8x384xbf16> to vector<1x8x8x384xbf16>
    %24 = vector.shape_cast %23 : vector<1x8x8x384xbf16> to vector<64x384xbf16>
    %c0_37 = arith.constant 0 : index
    %c0_38 = arith.constant 0 : index
    %c0_39 = arith.constant 0 : index
    %25 = vector.load %arg4[%c0_37, %c0_38, %c0_39] : memref<3x384x128xbf16, #tpu.memory_space<vmem>>, vector<1x384x128xbf16>
    %26 = vector.shape_cast %25 : vector<1x384x128xbf16> to vector<384x128xbf16>
    %cst_40 = arith.constant dense<0.000000e+00> : vector<64x128xf32>
    %27 = tpu.matmul %24, %26, %cst_40 {dimension_numbers = #tpu.dot_dimension_numbers<[1], [0], [0], [1], [0, 0, 1, 1], [], []>} : vector<64x384xbf16>, vector<384x128xbf16>, vector<64x128xf32> -> vector<64x128xf32>
    %28 = arith.addf %22, %27 : vector<64x128xf32>
    %29 = vector.extract_strided_slice %21 {offsets = [0, 1, 0, 0], sizes = [1, 8, 8, 384], strides = [1, 1, 1, 1]} : vector<1x10x8x384xbf16> to vector<1x8x8x384xbf16>
    %30 = vector.shape_cast %29 : vector<1x8x8x384xbf16> to vector<64x384xbf16>
    %c1_41 = arith.constant 1 : index
    %c0_42 = arith.constant 0 : index
    %c0_43 = arith.constant 0 : index
    %31 = vector.load %arg4[%c1_41, %c0_42, %c0_43] : memref<3x384x128xbf16, #tpu.memory_space<vmem>>, vector<1x384x128xbf16>
    %32 = vector.shape_cast %31 : vector<1x384x128xbf16> to vector<384x128xbf16>
    %cst_44 = arith.constant dense<0.000000e+00> : vector<64x128xf32>
    %33 = tpu.matmul %30, %32, %cst_44 {dimension_numbers = #tpu.dot_dimension_numbers<[1], [0], [0], [1], [0, 0, 1, 1], [], []>} : vector<64x384xbf16>, vector<384x128xbf16>, vector<64x128xf32> -> vector<64x128xf32>
    %34 = arith.addf %28, %33 : vector<64x128xf32>
    %35 = vector.extract_strided_slice %21 {offsets = [0, 2, 0, 0], sizes = [1, 8, 8, 384], strides = [1, 1, 1, 1]} : vector<1x10x8x384xbf16> to vector<1x8x8x384xbf16>
    %36 = vector.shape_cast %35 : vector<1x8x8x384xbf16> to vector<64x384xbf16>
    %c2 = arith.constant 2 : index
    %c0_45 = arith.constant 0 : index
    %c0_46 = arith.constant 0 : index
    %37 = vector.load %arg4[%c2, %c0_45, %c0_46] : memref<3x384x128xbf16, #tpu.memory_space<vmem>>, vector<1x384x128xbf16>
    %38 = vector.shape_cast %37 : vector<1x384x128xbf16> to vector<384x128xbf16>
    %cst_47 = arith.constant dense<0.000000e+00> : vector<64x128xf32>
    %39 = tpu.matmul %36, %38, %cst_47 {dimension_numbers = #tpu.dot_dimension_numbers<[1], [0], [0], [1], [0, 0, 1, 1], [], []>} : vector<64x384xbf16>, vector<384x128xbf16>, vector<64x128xf32> -> vector<64x128xf32>
    %40 = arith.addf %34, %39 : vector<64x128xf32>
    %c0_48 = arith.constant 0 : index
    %c0_49 = arith.constant 0 : index
    %41 = vector.load %arg5[%c0_48, %c0_49] : memref<1x128xf32, #tpu.memory_space<vmem>>, vector<1x128xf32>
    %42 = vector.broadcast %41 : vector<1x128xf32> to vector<64x128xf32>
    %43 = arith.addf %40, %42 : vector<64x128xf32>
    %cst_50 = arith.constant 0.000000e+00 : f32
    %44 = vector.broadcast %cst_50 : f32 to vector<64x128xf32>
    %45 = arith.maximumf %43, %44 : vector<64x128xf32>
    %46 = arith.truncf %45 : vector<64x128xf32> to vector<64x128xbf16>
    %c0_51 = arith.constant 0 : index
    %c0_52 = arith.constant 0 : index
    %47 = vector.load %arg6[%c0_51, %c0_52] : memref<128x128xbf16, #tpu.memory_space<vmem>>, vector<128x128xbf16>
    %cst_53 = arith.constant dense<0.000000e+00> : vector<64x128xf32>
    %48 = tpu.matmul %46, %47, %cst_53 {dimension_numbers = #tpu.dot_dimension_numbers<[1], [0], [0], [1], [0, 0, 1, 1], [], []>} : vector<64x128xbf16>, vector<128x128xbf16>, vector<64x128xf32> -> vector<64x128xf32>
    %c0_54 = arith.constant 0 : index
    %c0_55 = arith.constant 0 : index
    %49 = vector.load %arg7[%c0_54, %c0_55] : memref<1x128xf32, #tpu.memory_space<vmem>>, vector<1x128xf32>
    %50 = vector.broadcast %49 : vector<1x128xf32> to vector<64x128xf32>
    %51 = arith.addf %48, %50 : vector<64x128xf32>
    %52 = arith.extf %1 : vector<64x128xbf16> to vector<64x128xf32>
    %53 = arith.addf %51, %52 : vector<64x128xf32>
    %cst_56 = arith.constant 0.000000e+00 : f32
    %54 = vector.broadcast %cst_56 : f32 to vector<64x128xf32>
    %55 = arith.maximumf %53, %54 : vector<64x128xf32>
    %56 = vector.shape_cast %55 : vector<64x128xf32> to vector<1x8x8x128xf32>
    %57 = arith.truncf %56 : vector<1x8x8x128xf32> to vector<1x8x8x128xbf16>
    %c0_57 = arith.constant 0 : index
    %c0_58 = arith.constant 0 : index
    %c0_59 = arith.constant 0 : index
    %c0_60 = arith.constant 0 : index
    %58 = vector.load %arg8[%c0_57, %c0_58, %c0_59, %c0_60] : memref<1x8x8x128xbf16, #tpu.memory_space<vmem>>, vector<1x8x8x128xbf16>
    tpu.vector_store %arg8[%c0_57, %c0_58, %c0_59, %c0_60], %57 {strides = array<i32>} : memref<1x8x8x128xbf16, #tpu.memory_space<vmem>>, vector<1x8x8x128xbf16>,
    return
  }
  func.func @transform_0(%arg0: i32) -> (i32, i32, i32, i32) {
    %c0_i32 = arith.constant 0 : i32
    %c0_i32_0 = arith.constant 0 : i32
    %c0_i32_1 = arith.constant 0 : i32
    %c0_i32_2 = arith.constant 0 : i32
    return %arg0, %c0_i32, %c0_i32_0, %c0_i32_1 : i32, i32, i32, i32
  }
  func.func @transform_1(%arg0: i32) -> (i32, i32) {
    %c0_i32 = arith.constant 0 : i32
    %c0_i32_0 = arith.constant 0 : i32
    %c0_i32_1 = arith.constant 0 : i32
    return %c0_i32, %c0_i32_0 : i32, i32
  }
  func.func @transform_2(%arg0: i32) -> (i32, i32) {
    %c0_i32 = arith.constant 0 : i32
    %c0_i32_0 = arith.constant 0 : i32
    %c0_i32_1 = arith.constant 0 : i32
    return %c0_i32, %c0_i32_0 : i32, i32
  }
  func.func @transform_3(%arg0: i32) -> (i32, i32, i32) {
    %c0_i32 = arith.constant 0 : i32
    %c0_i32_0 = arith.constant 0 : i32
    %c0_i32_1 = arith.constant 0 : i32
    %c0_i32_2 = arith.constant 0 : i32
    return %c0_i32, %c0_i32_0, %c0_i32_1 : i32, i32, i32
  }
  func.func @transform_4(%arg0: i32) -> (i32, i32) {
    %c0_i32 = arith.constant 0 : i32
    %c0_i32_0 = arith.constant 0 : i32
    %c0_i32_1 = arith.constant 0 : i32
    return %c0_i32, %c0_i32_0 : i32, i32
  }
  func.func @transform_5(%arg0: i32) -> (i32, i32) {
    %c0_i32 = arith.constant 0 : i32
    %c0_i32_0 = arith.constant 0 : i32
    %c0_i32_1 = arith.constant 0 : i32
    return %c0_i32, %c0_i32_0 : i32, i32
  }
  func.func @transform_6(%arg0: i32) -> (i32, i32) {
    %c0_i32 = arith.constant 0 : i32
    %c0_i32_0 = arith.constant 0 : i32
    %c0_i32_1 = arith.constant 0 : i32
    return %c0_i32, %c0_i32_0 : i32, i32
  }
  func.func @transform_7(%arg0: i32) -> (i32, i32, i32, i32) {
    %c0_i32 = arith.constant 0 : i32
    %c0_i32_0 = arith.constant 0 : i32
    %c0_i32_1 = arith.constant 0 : i32
    %c0_i32_2 = arith.constant 0 : i32
    return %arg0, %c0_i32, %c0_i32_0, %c0_i32_1 : i32, i32, i32, i32
  }
}

</mosaic_0001>

<bundles_post_ra>
// kernel: tpu_custom_call.1
= control target key start
LH: loop header
LB: loop body
LE: loop exit
PB: predicated region body
PF: predicated region fallthrough
CT: control target
= control target key end

     0   :  { %12 = vsyncpa [#allocation4], 0  ;;  %s4048_s0 = inlined_call_operand.hbm [shape: bf16[2,8,8,128], index: 0, kind: input, shape index: {}]   ;;  %s4049_s1 = inlined_call_operand.hbm [shape: bf16[128,128], index: 1, kind: input, shape index: {}]   ;;  %s4050_s2 = inlined_call_operand.vmem [shape: f32[1,128], index: 2, kind: input, shape index: {}]   ;;  %s4051_s3 = inlined_call_operand.hbm [shape: bf16[3,384,128], index: 3, kind: input, shape index: {}]   ;;  %s4052_s4 = inlined_call_operand.vmem [shape: f32[1,128], index: 4, kind: input, shape index: {}]   ;;  %s4053_s5 = inlined_call_operand.hbm [shape: bf16[128,128], index: 5, kind: input, shape index: {}]   ;;  %s4054_s6 = inlined_call_operand.vmem [shape: f32[1,128], index: 6, kind: input, shape index: {}]   ;;  %s4055_s7 = inlined_call_operand.hbm [shape: bf16[2,8,8,128], index: 7, kind: output, shape index: {}]  }
   0x1   :  { %14 = vsyncpa [#allocation4 + $0x1], 0 }
   0x2   :  { %15 = vsyncpa [#allocation7], 0 }
   0x3   :  { %16 = vsyncpa [#allocation10], 0 }
   0x4   :  { %17 = vsyncpa [#allocation5], 0 }
   0x5   :  { %19 = vsyncpa [#allocation5 + $0x1], 0  ;;  %s3513_s24 = smov 0   ;;  %s3515_s25 = smov 0  }
   0x6   :  { %s3517_s26 = smov 0   ;;  %s3519_s27 = smov 0  }
   0x7 LB: > { %s3534_s28 = sadd.s32 4294967295, %s3462_s27   ;;  %s2510_s29 = sadd.s32 4294967294, %s3462_s27   ;;  %s3462_s27 = sphi %s3519_s27, %s4089_s27   ;;  %s3458_s26 = sphi %s3517_s26, %s4088_s26   ;;  %s3454_s25 = sphi %s3515_s25, %s4087_s25   ;;  %s3450_s24 = sphi %s3513_s24, %s4086_s24  }
   0x8   : > { %p45_p0 = scmp.ne.s32.totalorder %s3454_s25, %s3450_s24  ;;  %p4056_p1 = scmp.eq.s32.totalorder %s3534_s28, 0 }
   0x9   : > { %p201_p3 = scmp.eq.s32.totalorder %s2510_s29, 1  ;;  %p2511_p5 = scmp.ge.s32.totalorder %s3462_s27, 1 }
   0xa   : > { %p3543_p4 = por %p4056_p1, %p45_p0  ;;  %p208_p7 = scmp.lt.s32.totalorder %s3462_s27, 3 }
   0xb   : > { %p3548_p6 = por %p201_p3, %p45_p0  ;;  %s3464_s10 = smov [#allocation6]  }
   0xc   : > { %s4060_s30 = scalar_select %p3543_p4, 1, 0 }
   0xd   : > { %s4061_s8 = scalar_select %p3548_p6, 1, 0 }
   0xe   : > { %p3553_p8 = pnand %p2511_p5, %p208_p7  ;;  %s220_s11 = sshll.u32 %s3464_s10, 4  ;;  %s3557_s11 = int_to_ptr.vmem [resolvable:$true] %s220_s11 }
   0xf   : > { %4062 = sst [smem:[#allocation16_spill]] %s4061_s8  ;;  %s3465_s13 = smov [#allocation8]  }
  0x10   : > { %s4063_s9 = scalar_select %p3553_p8, 1, 0 }
  0x11   : > { %p3109_p9 = pneg %p3553_p8  ;;  %s236_s14 = sshll.u32 %s3465_s13, 4  ;;  %s3568_s14 = int_to_ptr.vmem [resolvable:$true] %s236_s14 }
  0x12   : > { %s3466_s15 = smov [#allocation9]   ;;  %s3274_s19 = scalar_lea.hbm %s4049_s1, 1024 }
  0x13   : > { %p3564_p11 = pnand %p3109_p9, %p4056_p1  ;;  %s3570_s16 = sshll.u32 %s3466_s15, 4  ;;  %s253_s16 = int_to_ptr.vmem [resolvable:$true] %s3570_s16 }
  0x14   : > { %p3275_p12 = scmp.ne.s32.totalorder %s4049_s1, %s3274_s19  ;;  %p3281_p5 = scmp.lt.u32.totalorder %s3274_s19, %s4049_s1 }
  0x15   : > { %p3580_p13 = pneg %p3564_p11 }
  0x17   : > { %p3277_p0 = pnand %p3580_p13, %p3275_p12 }
  0x19   : > { %p3278_p3 = pneg %p3277_p0 }
  0x1b   : > { %p3283_p7 = pnand %p3281_p5, %p3278_p3 }
  0x1d   : > { %3286 = shalt.err (!%p3283_p7)
}
  0x1e   : > { %s3287_s10 = scalar_lea.vmem %s3557_s11, 1024  ;;  %p3295_p2 = scmp.lt.s32.totalorder %s3557_s11, %s3557_s11 }
  0x1f   : > { %p3288_p9 = scmp.ne.s32.totalorder %s3557_s11, %s3287_s10  ;;  %p3296_p6 = scmp.lt.s32.totalorder %s3287_s10, %s3287_s10 }
  0x21   : > { %p3290_p10 = pnand %p3288_p9, %p3580_p13  ;;  %p3297_p12 = por %p3296_p6, %p3295_p2 }
  0x23   : > { %p3291_p1 = pneg %p3290_p10 }
  0x25   : > { %p3298_p0 = pnand %p3297_p12, %p3291_p1 }
  0x27   : > { %3301 = shalt.err (!%p3298_p0)
}
  0x28   : > { %s3467_s13 = smov 64   ;;  %s3468_s15 = smov 4  }
  0x29   : > { %3112 = dma.hbm_to_vmem [thread:$0]  (!%p3564_p11), %s4049_s1, 1024, %s3557_s11, [#allocation7], %s3467_s13, %s3467_s13, %s3468_s15  }
  0x2a   : > { %s3302_s21 = scalar_lea.hbm %s4051_s3, 9216 }
  0x2b   : > { %p3303_p1 = scmp.ne.s32.totalorder %s4051_s3, %s3302_s21  ;;  %p3309_p10 = scmp.lt.u32.totalorder %s3302_s21, %s4051_s3 }
  0x2d   : > { %p3305_p2 = pnand %p3303_p1, %p3580_p13 }
  0x2f   : > { %p3306_p6 = pneg %p3305_p2 }
  0x31   : > { %p3311_p3 = pnand %p3309_p10, %p3306_p6 }
  0x33   : > { %3314 = shalt.err (!%p3311_p3)
}
  0x34   : > { %s3315_s11 = scalar_lea.vmem %s3568_s14, 9216  ;;  %p3323_p12 = scmp.lt.s32.totalorder %s3568_s14, %s3568_s14 }
  0x35   : > { %p3316_p5 = scmp.ne.s32.totalorder %s3568_s14, %s3315_s11  ;;  %p3324_p0 = scmp.lt.s32.totalorder %s3315_s11, %s3315_s11 }
  0x37   : > { %p3318_p7 = pnand %p3316_p5, %p3580_p13  ;;  %p3325_p1 = por %p3324_p0, %p3323_p12 }
  0x39   : > { %p3319_p9 = pneg %p3318_p7 }
  0x3b   : > { %p3326_p2 = pnand %p3325_p1, %p3319_p9 }
  0x3d   : > { %3329 = shalt.err (!%p3326_p2)
}
  0x3e   : > { %3115 = dma.hbm_to_vmem [thread:$0]  (!%p3564_p11), %s4051_s3, 9216, %s3568_s14, [#allocation7], %s3467_s13, %s3467_s13, %s3468_s15  }
  0x3f   : > { %s3330_s20 = scalar_lea.hbm %s4053_s5, 1024 }
  0x40   : > { %p3331_p6 = scmp.ne.s32.totalorder %s4053_s5, %s3330_s20  ;;  %p3337_p5 = scmp.lt.u32.totalorder %s3330_s20, %s4053_s5 }
  0x42   : > { %p3333_p10 = pnand %p3331_p6, %p3580_p13 }
  0x44   : > { %p3334_p3 = pneg %p3333_p10 }
  0x46   : > { %p3339_p7 = pnand %p3337_p5, %p3334_p3 }
  0x48   : > { %3342 = shalt.err (!%p3339_p7)
}
  0x49   : > { %s3343_s11 = scalar_lea.vmem %s253_s16, 1024  ;;  %p3351_p1 = scmp.lt.s32.totalorder %s253_s16, %s253_s16 }
  0x4a   : > { %p3344_p9 = scmp.ne.s32.totalorder %s253_s16, %s3343_s11  ;;  %p3352_p2 = scmp.lt.s32.totalorder %s3343_s11, %s3343_s11 }
  0x4c   : > { %p3346_p12 = pnand %p3344_p9, %p3580_p13  ;;  %p3353_p4 = por %p3352_p2, %p3351_p1 }
  0x4e   : > { %p3347_p0 = pneg %p3346_p12 }
  0x50   : > { %p3354_p8 = pnand %p3353_p4, %p3347_p0 }
  0x52   : > { %3357 = shalt.err (!%p3354_p8)
}
  0x53   : > { %3118 = dma.hbm_to_vmem [thread:$0]  (!%p3564_p11), %s4053_s5, 1024, %s253_s16, [#allocation10], %s3467_s13, %s3467_s13, %s3468_s15  }
  0x54   : > { %s3653_s22 = sadd.s32 1, %s3462_s27   ;;  %s32_s17 = sadd.s32 1, %s3458_s26 }
  0x55   : > { %s29_s12 = ssub.s32 %s3462_s27, %s3653_s22  ;;  %p39_p8 = scmp.ne.s32.totalorder %s3458_s26, %s3454_s25 }
  0x56   : > { %p30_p4 = scmp.eq.s32.totalorder %s29_s12, 0  ;;  %p40_p13 = scmp.eq.s32.totalorder %s3462_s27, 0 }
  0x57   : > { %p3130_p6 = scmp.lt.s32.totalorder %s3462_s27, 2  ;;  %p4066_p3 = scmp.eq.s32.totalorder %s3534_s28, 1 }
  0x58   : > { %s3663_s18 = scalar_select %p30_p4, %s3458_s26, %s32_s17  }
  0x59   : > { %p41_p10 = por %p40_p13, %p39_p8  ;;  %p3667_p5 = por %p4066_p3, %p39_p8 }
  0x5a   : > { %s269_s20 = sand.u32 1, %s3458_s26   ;;  %s2720_s21 = sshll.u32 %s3462_s27, 9 }
  0x5b   : > { %s2516_s16 = sshll.u32 %s269_s20, 5  ;;  %s3676_s10 = scalar_lea.hbm %s4048_s0, %s2720_s21 }
  0x5c   : > { %s273_s11 = scalar_lea.vmem [#allocation3], %s2516_s16  ;;  %p3678_p11 = pnand %p3130_p6, %p41_p10 }
  0x5d   : > { %s280_s14 = sshll.u32 %s273_s11, 4  ;;  %s3684_s12 = scalar_lea.sflag [#allocation4], %s269_s20  ;;  %s3682_s14 = int_to_ptr.vmem [resolvable:$true] %s280_s14 }
  0x5e   : > { %s3358_s17 = scalar_lea.hbm %s3676_s10, 512  ;;  %p3360_p9 = pneg %p3678_p11 }
  0x5f   : > { %p3359_p7 = scmp.ne.s32.totalorder %s3676_s10, %s3358_s17  ;;  %s3363_s23 = scalar_lea.hbm %s4048_s0, 1024 }
  0x60   : > { %p3364_p1 = scmp.lt.u32.totalorder %s3676_s10, %s4048_s0  ;;  %p3365_p2 = scmp.lt.u32.totalorder %s3363_s23, %s3358_s17 }
  0x61   : > { %p3361_p12 = pnand %p3360_p9, %p3359_p7  ;;  %p3367_p8 = scmp.lt.u32.totalorder %s3358_s17, %s3676_s10 }
  0x62   : > { %p3366_p4 = por %p3365_p2, %p3364_p1 }
  0x63   : > { %p3362_p0 = pneg %p3361_p12 }
  0x64   : > { %p3368_p13 = por %p3367_p8, %p3366_p4 }
  0x66   : > { %p3369_p6 = pnand %p3368_p13, %p3362_p0 }
  0x68   : > { %3372 = shalt.err (!%p3369_p6)
}
  0x69   : > { %s3373_s20 = scalar_lea.vmem %s3682_s14, 512  ;;  %s3469_s21 = smov [#allocation3]  }
  0x6a   : > { %p3374_p10 = scmp.ne.s32.totalorder %s3682_s14, %s3373_s20  ;;  %s3378_s16 = sshll.u32 %s3469_s21, 4  ;;  %s3379_s16 = int_to_ptr.vmem [resolvable:$false] %s3378_s16 }
  0x6b   : > { %s3380_s29 = scalar_lea.vmem %s3379_s16, 1024  ;;  %p3381_p12 = scmp.lt.s32.totalorder %s3682_s14, %s3379_s16 }
  0x6c   : > { %p3376_p3 = pnand %p3374_p10, %p3360_p9  ;;  %p3382_p1 = scmp.lt.s32.totalorder %s3380_s29, %s3373_s20 }
  0x6e   : > { %p3377_p7 = pneg %p3376_p3  ;;  %p3383_p2 = por %p3382_p1, %p3381_p12 }
  0x70   : > { %p3384_p4 = pnand %p3383_p2, %p3377_p7 }
  0x72   : > { %3387 = shalt.err (!%p3384_p4)
}
  0x73   : > { %3122 = dma.hbm_to_vmem [thread:$0]  (!%p3678_p11), %s3676_s10, 512, %s3682_s14, %s3684_s12, %s3467_s13, %s3467_s13, %s3468_s15  }
  0x74   : > { %p4069_p9 = scmp.ne.s32.totalorder %s4063_s9, 0 }
  0x75   : > { %s3718_s17 = sand.u32 (!%p4069_p9), 1, %s3454_s25   ;;  %p4070_p0 = scmp.ne.s32.totalorder (!%p4069_p9), %s4060_s30, 0 }
  0x76   : > { %292 = sbr.rel (%p4069_p9) target bundleno = 984 (0x3d8), region = 48  ;;  %s2520_s23 = sshll.u32 (!%p4069_p9), %s3718_s17, 5 }
  0x77   : > { %s295_s11 = scalar_lea.sflag (!%p4069_p9), [#allocation4], %s3718_s17  ;;  %s3724_s8 = scalar_lea.vmem (!%p4069_p9), [#allocation3], %s2520_s23 }
  0x7d   : > { %3433 = dma.done.wait (%p4070_p0), %s295_s11, 512  }
  0x7e   : > { %3435 = vsyncadd (%p4070_p0), %s295_s11, 4294966784  ;;  %p4071_p11 = scmp.eq.s32.totalorder %s3534_s28, 0 }
  0x80   : > { %3437 = dma.done.wait (%p4071_p11), [#allocation7], 10240   ;;  %p4072_p8 = pmov %p4071_p11 }
  0x82   : > { %3439 = vsyncadd (%p4072_p8), [#allocation7], 4294957056  ;;  %p4073_p13 = pmov %p4072_p8 }
  0x83   : > { %p4074_p6 = pmov %p4072_p8 }
  0x84   : > { %3441 = dma.done.wait (%p4073_p13), [#allocation10], 1024  }
  0x85   : > { %3443 = vsyncadd (%p4074_p6), [#allocation10], 4294966272  ;;  %v3174_v0 = vld [vmem:[#allocation6] sm:$0xff]   ;;  %v3175_v1 = vld [vmem:[#allocation6 + $0x8] sm:$0xff]   ;;  %vm557_vm0 = vsmask.f32 4352 }
  0x86   : > { %2933 = vmatprep.subr.bf16.mxu0 %v3174_v0  ;;  %v3176_v2 = vld [vmem:[#allocation6 + $0x10] sm:$0xff]   ;;  %v3177_v3 = vld [vmem:[#allocation6 + $0x18] sm:$0xff]   ;;  %v342_v4 = vld [vmem:[%s3724_s8] sm:$0xff]   ;;  %vm594_vm1 = vcmask 1044484   ;;  %vm550_vm3 = vcmask 1047559   ;;  %vm556_vm6 = vcmask 1044480  }
  0x87   : > { %2934 = vmatpush3.bf16.msra.mxu0 %v3174_v0  ;;  %v3178_v5 = vld [vmem:[#allocation6 + $0x20] sm:$0xff]   ;;  %2949 = vmatprep.mubr.bf16.mxu0 %v342_v4  ;;  %v3179_v6 = vld [vmem:[#allocation6 + $0x28] sm:$0xff]   ;;  %v3180_v7 = vld [vmem:[#allocation6 + $0x30] sm:$0xff]   ;;  %vm551_vm4 = vsmask.f32 7966  ;;  %s3989_s12 = scalar_lea.vmem [#allocation11], %s2520_s23 }
  0x88   : > { %2935 = vmatprep.subr.bf16.mxu0 %v3175_v1  ;;  %v3181_v8 = vld [vmem:[#allocation6 + $0x38] sm:$0xff]   ;;  %v344_v9 = vld [vmem:[%s3724_s8 + $0x8] sm:$0xff]   ;;  %v346_v10 = vld [vmem:[%s3724_s8 + $0x10] sm:$0xff]   ;;  %vm844_vm8 = vsmask.f32 256  ;;  %s2408_s20 = sshll.u32 %s3989_s12, 4  ;;  %s3997_s20 = int_to_ptr.vmem [resolvable:$true] %s2408_s20 }
  0x89   : > { %v3186_v11 = vld [vmem:[#allocation8 + $0x140] sm:$0xff]   ;;  %v348_v12 = vld [vmem:[%s3724_s8 + $0x18] sm:$0xff]   ;;  %v3188_v13 = vld [vmem:[#allocation8 + $0x148] sm:$0xff]   ;;  %vm845_vm9 = vsmask.f32 4368  ;;  %s2729_s21 = sshll.u32 %s3534_s28, 9 }
  0x8a   : > { %v3187_v14 = vld [vmem:[#allocation8 + $0x100] sm:$0xff]   ;;  %v3191_v16 = vld [vmem:[#allocation8 + $0x150] sm:$0xff]   ;;  %vm3743_vm2 = vmand %vm594_vm1, %vm557_vm0  ;;  %s4002_s23 = scalar_lea.hbm %s4055_s7, %s2729_s21  ;;  %s2395_s11 = scalar_lea.sflag [#allocation5], %s3718_s17 }
  0x8b   : > { %2936 = vmatpush3.bf16.msra.mxu0 %v3175_v1  ;;  %v3189_v15 = vld [vmem:[#allocation8 + $0xc0] sm:$0xff]   ;;  %2765 = vmatprep.subr.bf16.mxu1 %v3187_v14  ;;  %v602_v18 = vld [vmem:[#allocation2 + $0x38] sm:$0x10]  ;;  %v3190_v19 = vld [vmem:[#allocation8 + $0x108] sm:$0xff]   ;;  %s3388_s28 = scalar_lea.vmem %s3997_s20, 512 }
  0x8c   : > { %2937 = vmatprep.subr.bf16.mxu0 %v3176_v2  ;;  %2766 = vmatpush3.bf16.msra.mxu1 %v3189_v15  ;;  %v596_v20 = vld [vmem:[#allocation2 + $0x18] sm:$0x10]  ;;  %v603_v21 = vsel %vm3743_vm2, 0, %v602_v18  ;;  %v3192_v22 = vld [vmem:[#allocation8 + $0xc8] sm:$0xff]   ;;  %v3193_v29 = vld [vmem:[#allocation8 + $0x110] sm:$0xff]   ;;  %p3389_p10 = scmp.ne.s32.totalorder %s3997_s20, %s3388_s28 }
  0x8d   : > { %v597_v23 = vsel %vm3743_vm2, 0, %v596_v20  ;;  %604 = vst [vmem:[#allocation2 + $0x38] sm:$0x10] %v603_v21  ;;  %v605_v24 = vld [vmem:[#allocation2 + $0x48] sm:$0x10]  ;;  %2767 = vmatprep.subr.bf16.mxu1 %v3190_v19  ;;  %v3194_v27 = vld [vmem:[#allocation8 + $0x158] sm:$0xff]   ;;  %vm3755_vm5 = vmand %vm550_vm3, %vm551_vm4 }
  0x8e   : > { %598 = vst [vmem:[#allocation2 + $0x18] sm:$0x10] %v597_v23  ;;  %v599_v25 = vld [vmem:[#allocation2 + $0x28] sm:$0x10]  ;;  %v606_v26 = vsel %vm3743_vm2, 0, %v605_v24  ;;  %v3195_v30 = vld [vmem:[#allocation8 + $0xd0] sm:$0xff]   ;;  %vm3768_vm7 = vmand %vm556_vm6, %vm557_vm0  ;;  %p3390_p3 = pnand %p3389_p10, %p3667_p5 }
  0x8f   : > { %2938 = vmatpush3.bf16.msra.mxu0 %v3176_v2  ;;  %v600_v28 = vsel %vm3743_vm2, 0, %v599_v25  ;;  %607 = vst [vmem:[#allocation2 + $0x48] sm:$0x10] %v606_v26  ;;  %v3197_v32 = vld [vmem:[#allocation8 + $0x160] sm:$0xff]   ;;  %v570_v33 = vld [vmem:[#allocation2 + $0x10] sm:$0x80]  ;;  %vm3804_vm10 = vmor %vm844_vm8, %vm845_vm9 }
  0x90   : > { %2939 = vmatprep.subr.bf16.mxu0 %v3177_v3  ;;  %2768 = vmatpush3.bf16.msra.mxu1 %v3192_v22  ;;  %601 = vst [vmem:[#allocation2 + $0x28] sm:$0x10] %v600_v28  ;;  %v3196_v34 = vld [vmem:[#allocation8 + $0x118] sm:$0xff]   ;;  %v571_v35 = vsel %vm3755_vm5, 0, %v570_v33  ;;  %v573_v37 = vld [vmem:[#allocation2 + $0x20] sm:$0x80]  ;;  %p3391_p7 = pneg %p3390_p3 }
  0x91   : > { %2769 = vmatprep.subr.bf16.mxu1 %v3193_v29  ;;  %v3198_v36 = vld [vmem:[#allocation8 + $0xd8] sm:$0xff]   ;;  %572 = vst [vmem:[#allocation2 + $0x10] sm:$0x80] %v571_v35  ;;  %v574_v38 = vsel %vm3755_vm5, 0, %v573_v37  ;;  %v3200_v39 = vld [vmem:[#allocation8 + $0x168] sm:$0xff]   ;;  %v3199_v41 = vld [vmem:[#allocation8 + $0x120] sm:$0xff]  }
  0x92   : > { %575 = vst [vmem:[#allocation2 + $0x20] sm:$0x80] %v574_v38  ;;  %v576_v40 = vld [vmem:[#allocation2 + $0x30] sm:$0x80]  ;;  %v3201_v42 = vld [vmem:[#allocation8 + $0xe0] sm:$0xff]   ;;  %v3202_v43 = vld [vmem:[#allocation8 + $0x128] sm:$0xff]  }
  0x93   : > { %2940 = vmatpush3.bf16.msra.mxu0 %v3177_v3  ;;  %v577_v44 = vsel %vm3755_vm5, 0, %v576_v40  ;;  %v3203_v45 = vld [vmem:[#allocation8 + $0x170] sm:$0xff]   ;;  %v3204_v46 = vld [vmem:[#allocation8 + $0xe8] sm:$0xff]   ;;  %v3206_v47 = vld [vmem:[#allocation8 + $0x178] sm:$0xff]  }
  0x94   : > { %2941 = vmatprep.subr.bf16.mxu0 %v3178_v5  ;;  %2770 = vmatpush3.bf16.msra.mxu1 %v3195_v30  ;;  %578 = vst [vmem:[#allocation2 + $0x30] sm:$0x80] %v577_v44  ;;  %v579_v48 = vld [vmem:[#allocation2 + $0x40] sm:$0x80]  ;;  %v3205_v49 = vld [vmem:[#allocation8 + $0x130] sm:$0xff]   ;;  %v3208_v55 = vld [vmem:[#allocation8 + $0x138] sm:$0xff]  }
  0x95   : > { %2771 = vmatprep.subr.bf16.mxu1 %v3196_v34  ;;  %v580_v50 = vsel %vm3755_vm5, 0, %v579_v48  ;;  %v559_v52 = vld [vmem:[#allocation2 + $0x8] sm:$0x1f]  ;;  %v3207_v54 = vld [vmem:[#allocation8 + $0xf0] sm:$0xff]   ;;  %v608_v56 = vld [vmem:[#allocation2 + $0x58] sm:$0x10] }
  0x96   : > { %581 = vst [vmem:[#allocation2 + $0x40] sm:$0x80] %v580_v50  ;;  %v560_v53 = vsel %vm3768_vm7, 0, %v559_v52  ;;  %v609_v57 = vsel %vm3743_vm2, 0, %v608_v56  ;;  %v611_v58 = vld [vmem:[#allocation2 + $0x68] sm:$0x10] }
  0x97   : > { %2942 = vmatpush3.bf16.msra.mxu0 %v3178_v5  ;;  %561 = vst [vmem:[#allocation2 + $0x8] sm:$0x1f] %v560_v53  ;;  %610 = vst [vmem:[#allocation2 + $0x58] sm:$0x10] %v609_v57  ;;  %v3776_v59 = vld [vmem:[#allocation8 + $0x80] sm:$0xff]   ;;  %v3210_v60 = vld [vmem:[#allocation8 + $0xf8] sm:$0xff]  }
  0x98   : > { %2943 = vmatprep.subr.bf16.mxu0 %v3179_v6  ;;  %2772 = vmatpush3.bf16.msra.mxu1 %v3198_v36  ;;  %v612_v61 = vsel %vm3743_vm2, 0, %v611_v58  ;;  %v614_v62 = vld [vmem:[#allocation2 + $0x78] sm:$0x10]  ;;  %v617_v0 = vld [vmem:[#allocation2 + $0x88] sm:$0x10]  ;;  %v3211_v3 = vld [vmem:[#allocation8 + $0x40] sm:$0xff]  }
  0x99   : > { %2773 = vmatprep.subr.bf16.mxu1 %v3199_v41  ;;  %613 = vst [vmem:[#allocation2 + $0x68] sm:$0x10] %v612_v61  ;;  %v615_v63 = vsel %vm3743_vm2, 0, %v614_v62  ;;  %v618_v1 = vsel %vm3743_vm2, 0, %v617_v0  ;;  %v582_v2 = vld [vmem:[#allocation2 + $0x50] sm:$0x80] }
  0x9a   : > { %616 = vst [vmem:[#allocation2 + $0x78] sm:$0x10] %v615_v63  ;;  %619 = vst [vmem:[#allocation2 + $0x88] sm:$0x10] %v618_v1  ;;  %v583_v4 = vsel %vm3755_vm5, 0, %v582_v2  ;;  %v3263_v56 = vld [vmem:[#allocation9 + $0x28] sm:$0xff]  }
  0x9b   : > { %2944 = vmatpush3.bf16.msra.mxu0 %v3179_v6  ;;  %584 = vst [vmem:[#allocation2 + $0x50] sm:$0x80] %v583_v4  ;;  %v585_v5 = vld [vmem:[#allocation2 + $0x60] sm:$0x80]  ;;  %v563_v15 = vld [vmem:[#allocation2 + $0x90] sm:$0x80] }
  0x9c   : > { %2945 = vmatprep.subr.bf16.mxu0 %v3180_v7  ;;  %2774 = vmatpush3.bf16.msra.mxu1 %v3201_v42  ;;  %v553_v6 = vld [vmem:[#allocation2] sm:$0x80]  ;;  %v2525_v19 = vld [vmem:[%s4050_s2] ss:$0 sm:$0xff] }
  0x9d   : > { %2775 = vmatprep.subr.bf16.mxu1 %v3202_v43 }
  0x9e   : > { %v648_v17 = vld [vmem:[#allocation2 + $0x8] sm:$0x1f] }
  0x9f   : > { %2946 = vmatpush3.bf16.msra.mxu0 %v3180_v7  ;;  %v586_v7 = vsel %vm3755_vm5, 0, %v585_v5  ;;  %v738_v18 = vrot.slane %v648_v17, 1  ;;  %v629_v22 = vld [vmem:[#allocation2 + $0x8] sm:$0xf] }
  0xa0   : > { %2947 = vmatprep.subr.bf16.mxu0 %v3181_v8  ;;  %2776 = vmatpush3.bf16.msra.mxu1 %v3204_v46  ;;  %587 = vst [vmem:[#allocation2 + $0x60] sm:$0x80] %v586_v7  ;;  %v662_v44 = vshrl.u32 %v629_v22, 16 }
  0xa1   : > { %2777 = vmatprep.subr.bf16.mxu1 %v3205_v49  ;;  %v2549_v20 = vcombine.low %v738_v18, %v738_v18  ;;  %v2547_v25 = vcombine.high %v738_v18, %v738_v18 }
  0xa3   : > { %2948 = vmatpush3.bf16.msra.mxu0 %v3181_v8  ;;  %v554_v8 = vsel %vm3755_vm5, 0, %v553_v6  ;;  %v866_v28 = vshrl.u32 %v2549_v20, 16  ;;  %v861_v37 = vshrl.u32 %v2547_v25, 16  ;;  %v869_v41 = vshll.u32 %v2549_v20, 16 }
  0xa4   : > { %2957 = vmatprep.subr.bf16.mxu0 %v3186_v11  ;;  %2778 = vmatpush3.bf16.msra.mxu1 %v3207_v54  ;;  %555 = vst [vmem:[#allocation2] sm:$0x80] %v554_v8 }
  0xa5   : > { %2779 = vmatprep.subr.bf16.mxu1 %v3208_v55  ;;  %v868_v40 = vrot.slane %v866_v28, 7  ;;  %v2579_v51 = vrot.slane %v861_v37, 11 }
  0xa6   : > { %2950 = vmatmul.mubr.bf16.vlgmr.msra.gmra.mrb[0].mxu0 %v344_v9  ;;  %v588_v9 = vld [vmem:[#allocation2 + $0x70] sm:$0x80] }
  0xa7   : > { %2953 = vmatprep.mubr.bf16.mxu0 %v346_v10  ;;  %2958 = vmatpush3.bf16.msra.mxu0 %v3186_v11  ;;  %v589_v10 = vsel %vm3755_vm5, 0, %v588_v9  ;;  %v566_v11 = vld [vmem:[#allocation2 + $0x98] sm:$0x1f]  ;;  %v871_v52 = vor.u32 %v869_v41, %v868_v40 }
  0xa8   : > { %2959 = vmatprep.subr.bf16.mxu0 %v3188_v13  ;;  %2780 = vmatpush3.bf16.msra.mxu1 %v3210_v60  ;;  %590 = vst [vmem:[#allocation2 + $0x70] sm:$0x80] %v589_v10 }
  0xa9   : > { %2817 = vmatprep.subr.bf16.mxu1 %v3211_v3  ;;  %v3815_v4 = vsel %vm3804_vm10, %v2579_v51, %v871_v52  ;;  %v630_v51 = vld [vmem:[#allocation2 + $0x10] sm:$0x80] }
  0xab   : > { %2960 = vmatpush3.bf16.msra.mxu0 %v3188_v13  ;;  %v567_v13 = vsel %vm3768_vm7, 0, %v566_v11  ;;  %v3809_v63 = vld [vmem:[#allocation2] sm:$0x80] }
  0xac   : > { %2961 = vmatprep.subr.bf16.mxu0 %v3191_v16  ;;  %568 = vst [vmem:[#allocation2 + $0x98] sm:$0x1f] %v567_v13 }
  0xae   : > { %2954 = vmatmul.mubr.bf16.gmra.mrb[4].mxu0 %v348_v12  ;;  %v591_v12 = vld [vmem:[#allocation2 + $0x80] sm:$0x80] }
  0xaf   : > { %2962 = vmatpush3.bf16.msra.mxu0 %v3191_v16  ;;  %v592_v14 = vsel %vm3755_vm5, 0, %v591_v12  ;;  %v564_v16 = vsel %vm3755_vm5, 0, %v563_v15 }
  0xb0   : > { %2963 = vmatprep.subr.bf16.mxu0 %v3194_v27  ;;  %593 = vst [vmem:[#allocation2 + $0x80] sm:$0x80] %v592_v14  ;;  %565 = vst [vmem:[#allocation2 + $0x90] sm:$0x80] %v564_v16 }
  0xb3   : > { %2964 = vmatpush3.bf16.msra.mxu0 %v3194_v27 }
  0xb4   : > { %2965 = vmatprep.subr.bf16.mxu0 %v3197_v32 }
  0xb7   : > { %2966 = vmatpush3.bf16.msra.mxu0 %v3197_v32  ;;  %v659_v32 = vshll.u32 %v629_v22, 16 }
  0xb8   : > { %2967 = vmatprep.subr.bf16.mxu0 %v3200_v39 }
  0xb9   : > { %v3802_v43 = vrot.slane %v659_v32, 1 }
  0xbb   : > { %2968 = vmatpush3.bf16.msra.mxu0 %v3200_v39  ;;  %v664_v57 = vor.u32 %v662_v44, %v3802_v43  ;;  %v2546_v15 = vcombine.high %v3809_v63, %v3802_v43 }
  0xbc   : > { %2969 = vmatprep.subr.bf16.mxu0 %v3203_v45 }
  0xbd   : > { %v3818_v10 = vcombine.low %v629_v22, %v664_v57 }
  0xbf   : > { %2970 = vmatpush3.bf16.msra.mxu0 %v3203_v45 }
  0xc0   : > { %2971 = vmatprep.subr.bf16.mxu0 %v3206_v47 }
  0xc3   : > { %2972 = vmatpush3.bf16.msra.mxu0 %v3206_v47 }
  0xc4   : > { %2981 = vmatprep.subr.bf16.mxu0 %v3776_v59 }
 0x179   : > { %v2951_v21 = vpop.f32.mrb[0].mxu0 }
 0x17a   : > { %v488_v23 = vadd.f32 %v2951_v21, %v2525_v19  ;;  %v479_v24 = vpop.f32.mrb[1].mxu0 }
 0x17b   : > { %v480_v26 = vadd.f32 %v2525_v19, %v479_v24  ;;  %v2952_v27 = vpop.f32.mrb[2].mxu0 }
 0x17c   : > { %v512_v29 = vmax.f32 %v488_v23, 0.0  ;;  %v491_v30 = vadd.f32 %v2952_v27, %v2525_v19  ;;  %v482_v31 = vpop.f32.mrb[3].mxu0 }
 0x17d   : > { %v510_v33 = vmax.f32 %v480_v26, 0.0  ;;  %v483_v34 = vadd.f32 %v2525_v19, %v482_v31 }
 0x17e   : > { %v2723_v35 = vpack.c.bf16 %v512_v29, %v512_v29  ;;  %v513_v36 = vmax.f32 %v491_v30, 0.0 }
 0x17f   : > { %v2721_v38 = vpack.c.bf16 %v510_v33, %v510_v33  ;;  %v511_v39 = vmax.f32 %v483_v34, 0.0 }
 0x180   : > { %622 = vst [vmem:[#allocation2 + $0x38] sm:$0xf] %v2723_v35  ;;  %v2724_v42 = vpack.c.bf16 %v513_v36, %v513_v36 }
 0x181   : > { %620 = vst [vmem:[#allocation2 + $0x18] sm:$0xf] %v2721_v38  ;;  %v2722_v45 = vpack.c.bf16 %v511_v39, %v511_v39  ;;  %v2955_v46 = vpop.f32.mrb[4].mxu0 }
 0x182   : > { %623 = vst [vmem:[#allocation2 + $0x48] sm:$0xf] %v2724_v42  ;;  %v504_v47 = vadd.f32 %v2955_v46, %v2525_v19  ;;  %v495_v48 = vpop.f32.mrb[5].mxu0 }
 0x183   : > { %621 = vst [vmem:[#allocation2 + $0x28] sm:$0xf] %v2722_v45  ;;  %v496_v49 = vadd.f32 %v2525_v19, %v495_v48  ;;  %v2956_v50 = vpop.f32.mrb[6].mxu0 }
 0x184   : > { %v516_v53 = vmax.f32 %v504_v47, 0.0  ;;  %v507_v54 = vadd.f32 %v2956_v50, %v2525_v19  ;;  %v498_v55 = vpop.f32.mrb[7].mxu0 }
 0x185   : > { %v514_v58 = vmax.f32 %v496_v49, 0.0  ;;  %v499_v60 = vadd.f32 %v2525_v19, %v498_v55 }
 0x186   : > { %v2727_v61 = vpack.c.bf16 %v516_v53, %v516_v53  ;;  %v517_v62 = vmax.f32 %v507_v54, 0.0 }
 0x187   : > { %v2725_v0 = vpack.c.bf16 %v514_v58, %v514_v58  ;;  %v515_v1 = vmax.f32 %v499_v60, 0.0  ;;  %v651_v2 = vld [vmem:[#allocation2 + $0x38] sm:$0x1f] }
 0x188   : > { %v3811_v3 = vld [vmem:[#allocation2 + $0x38] sm:$0xf]  ;;  %626 = vst [vmem:[#allocation2 + $0x78] sm:$0xf] %v2727_v61  ;;  %v2728_v5 = vpack.c.bf16 %v517_v62, %v517_v62  ;;  %v741_v7 = vrot.slane %v651_v2, 1 }
 0x189   : > { %v649_v6 = vld [vmem:[#allocation2 + $0x18] sm:$0x1f]  ;;  %v680_v9 = vshll.u32 %v3811_v3, 16  ;;  %624 = vst [vmem:[#allocation2 + $0x58] sm:$0xf] %v2725_v0  ;;  %v2726_v11 = vpack.c.bf16 %v515_v1, %v515_v1 }
 0x18a   : > { %v631_v8 = vld [vmem:[#allocation2 + $0x18] sm:$0xf]  ;;  %v652_v12 = vld [vmem:[#allocation2 + $0x48] sm:$0x1f]  ;;  %v739_v13 = vrot.slane %v649_v6, 1  ;;  %v2559_v18 = vcombine.high %v741_v7, %v741_v7  ;;  %v2561_v19 = vcombine.low %v741_v7, %v741_v7 }
 0x18b   : > { %v666_v14 = vshll.u32 %v631_v8, 16  ;;  %627 = vst [vmem:[#allocation2 + $0x88] sm:$0xf] %v2728_v5  ;;  %v650_v16 = vld [vmem:[#allocation2 + $0x28] sm:$0x1f]  ;;  %v742_v17 = vrot.slane %v652_v12, 1 }
 0x18c   : > { %v669_v20 = vshrl.u32 %v631_v8, 16  ;;  %625 = vst [vmem:[#allocation2 + $0x68] sm:$0xf] %v2726_v11  ;;  %v740_v21 = vrot.slane %v650_v16, 1  ;;  %v2551_v23 = vcombine.high %v739_v13, %v739_v13  ;;  %v2553_v24 = vcombine.low %v739_v13, %v739_v13  ;;  %v633_v46 = vld [vmem:[#allocation2 + $0x28] sm:$0xf] }
 0x18d   : > { %v3822_v22 = vrot.slane %v680_v9, 1  ;;  %v2563_v25 = vcombine.high %v742_v17, %v742_v17  ;;  %v2565_v26 = vcombine.low %v742_v17, %v742_v17  ;;  %v939_v27 = vshrl.u32 %v2559_v18, 16  ;;  %v637_v57 = vld [vmem:[#allocation2 + $0x48] sm:$0xf]  ;;  %v632_v1 = vld [vmem:[#allocation2 + $0x20] sm:$0x80] }
 0x18e   : > { %v944_v28 = vshrl.u32 %v2561_v19, 16  ;;  %v2555_v29 = vcombine.high %v740_v21, %v740_v21  ;;  %v2557_v30 = vcombine.low %v740_v21, %v740_v21  ;;  %v887_v31 = vshrl.u32 %v2551_v23, 16  ;;  %v634_v17 = vld [vmem:[#allocation2 + $0x30] sm:$0x80]  ;;  %v3212_v23 = vld [vmem:[#allocation8 + $0x88] sm:$0xff]  }
 0x18f   : > { %v892_v32 = vshrl.u32 %v2553_v24, 16  ;;  %v895_v33 = vshll.u32 %v2553_v24, 16  ;;  %v947_v35 = vshll.u32 %v2561_v19, 16  ;;  %v668_v36 = vrot.slane %v666_v14, 1  ;;  %v636_v24 = vld [vmem:[#allocation2 + $0x40] sm:$0x80] }
 0x190   : > { %v946_v34 = vrot.slane %v944_v28, 7  ;;  %v913_v38 = vshrl.u32 %v2555_v29, 16  ;;  %v918_v39 = vshrl.u32 %v2557_v30, 16  ;;  %v2585_v40 = vrot.slane %v939_v27, 11 }
 0x191   : > { %v894_v37 = vrot.slane %v892_v32, 7  ;;  %v2581_v41 = vrot.slane %v887_v31, 11  ;;  %v965_v44 = vshrl.u32 %v2563_v25, 16  ;;  %v970_v45 = vshrl.u32 %v2565_v26, 16  ;;  %v653_v25 = vld [vmem:[#allocation2 + $0x58] sm:$0x1f] }
 0x192   : > { %v949_v42 = vor.u32 %v947_v35, %v946_v34  ;;  %v2583_v48 = vrot.slane %v913_v38, 11  ;;  %v920_v49 = vrot.slane %v918_v39, 7  ;;  %v921_v50 = vshll.u32 %v2557_v30, 16 }
 0x193   : > { %v897_v47 = vor.u32 %v895_v33, %v894_v37  ;;  %v972_v53 = vrot.slane %v970_v45, 7  ;;  %v973_v54 = vshll.u32 %v2565_v26, 16  ;;  %v671_v55 = vor.u32 %v669_v20, %v668_v36  ;;  %v654_v37 = vld [vmem:[#allocation2 + $0x68] sm:$0x1f] }
 0x194   : > { %v3826_v52 = vsel %vm3804_vm10, %v2585_v40, %v949_v42  ;;  %v923_v60 = vor.u32 %v921_v50, %v920_v49  ;;  %v2587_v61 = vrot.slane %v965_v44, 11  ;;  %v673_v62 = vshll.u32 %v633_v46, 16  ;;  %v3215_v44 = vld [vmem:[#allocation8 + $0x90] sm:$0xff]  }
 0x195   : > { %v3830_v58 = vsel %vm3804_vm10, %v2581_v41, %v897_v47  ;;  %v975_v0 = vor.u32 %v973_v54, %v972_v53  ;;  %v676_v2 = vshrl.u32 %v633_v46, 16  ;;  %v2550_v5 = vcombine.high %v630_v51, %v668_v36 }
 0x196   : > { %v2552_v6 = vcombine.low %v631_v8, %v671_v55  ;;  %v3834_v7 = vsel %vm3804_vm10, %v2583_v48, %v923_v60  ;;  %v675_v9 = vrot.slane %v673_v62, 1  ;;  %v683_v11 = vshrl.u32 %v3811_v3, 16 }
 0x197   : > { %v687_v12 = vshll.u32 %v637_v57, 16  ;;  %v3839_v13 = vsel %vm3804_vm10, %v2587_v61, %v975_v0  ;;  %v2602_v14 = vcombine.low %v3830_v58, %v3834_v7  ;;  %v874_v16 = vshrl.u32 %v2550_v5, 16 }
 0x198   : > { %v690_v18 = vshrl.u32 %v637_v57, 16  ;;  %v2605_v8 = vcombine.low %v3826_v52, %v3839_v13  ;;  %v678_v19 = vor.u32 %v676_v2, %v675_v9  ;;  %v2554_v20 = vcombine.high %v632_v1, %v675_v9 }
 0x199   : > { %v879_v21 = vshrl.u32 %v2552_v6, 16  ;;  %2973 = vmatprep.mubr.bf16.mxu0 %v2602_v14  ;;  %v2580_v26 = vrot.slane %v874_v16, 11  ;;  %v882_v27 = vshll.u32 %v2552_v6, 16  ;;  %v685_v28 = vor.u32 %v683_v11, %v3822_v22  ;;  %v655_v6 = vld [vmem:[#allocation2 + $0x78] sm:$0x1f] }
 0x19a   : > { %v689_v29 = vrot.slane %v687_v12, 1  ;;  %2974 = vmatmul.mubr.bf16.vlgmr.msra.gmra.mrb[8].mxu0 %v2605_v8  ;;  %v2556_v30 = vcombine.low %v633_v46, %v678_v19  ;;  %v900_v32 = vshrl.u32 %v2554_v20, 16  ;;  %v2558_v33 = vcombine.high %v634_v17, %v3822_v22  ;;  %v656_v16 = vld [vmem:[#allocation2 + $0x88] sm:$0x1f]  ;;  %v3213_v8 = vld [vmem:[#allocation8] sm:$0xff]  }
 0x19b   : > { %v881_v31 = vrot.slane %v879_v21, 7  ;;  %2982 = vmatpush3.bf16.msra.mxu0 %v3776_v59  ;;  %v2560_v35 = vcombine.low %v3811_v3, %v685_v28  ;;  %v743_v38 = vrot.slane %v653_v25, 1  ;;  %v744_v3 = vrot.slane %v654_v37, 1 }
 0x19c   : > { %v692_v34 = vor.u32 %v690_v18, %v689_v29  ;;  %v2562_v36 = vcombine.high %v636_v24, %v689_v29  ;;  %v2582_v40 = vrot.slane %v900_v32, 11  ;;  %v905_v41 = vshrl.u32 %v2556_v30, 16  ;;  %2983 = vmatprep.subr.bf16.mxu0 %v3212_v23 }
 0x19d   : > { %v884_v39 = vor.u32 %v882_v27, %v881_v31  ;;  %v908_v42 = vshll.u32 %v2556_v30, 16  ;;  %v926_v46 = vshrl.u32 %v2558_v33, 16  ;;  %v931_v47 = vshrl.u32 %v2560_v35, 16  ;;  %v3869_v31 = vld [vmem:[#allocation2 + $0x58] sm:$0xf] }
 0x19e   : > { %v2564_v45 = vcombine.low %v637_v57, %v692_v34  ;;  %v934_v48 = vshll.u32 %v2560_v35, 16  ;;  %v907_v59 = vrot.slane %v905_v41, 7  ;;  %v952_v49 = vshrl.u32 %v2562_v36, 16  ;;  %v3218_v57 = vld [vmem:[#allocation8 + $0x98] sm:$0xff]   ;;  %v3221_v36 = vld [vmem:[#allocation8 + $0xa0] sm:$0xff]   ;;  %v3216_v41 = vld [vmem:[#allocation8 + $0x8] sm:$0xff]  }
 0x19f   : > { %v3851_v22 = vsel %vm3804_vm10, %v2580_v26, %v884_v39  ;;  %2984 = vmatpush3.bf16.msra.mxu0 %v3212_v23  ;;  %v2584_v50 = vrot.slane %v926_v46, 11  ;;  %v933_v51 = vrot.slane %v931_v47, 7  ;;  %v2567_v61 = vcombine.high %v743_v38, %v743_v38  ;;  %v3214_v26 = vld [vmem:[#allocation8 + $0x48] sm:$0xff]   ;;  %v3217_v46 = vld [vmem:[#allocation8 + $0x50] sm:$0xff]  }
 0x1a0   : > { %v957_v53 = vshrl.u32 %v2564_v45, 16  ;;  %v960_v54 = vshll.u32 %v2564_v45, 16  ;;  %v910_v55 = vor.u32 %v908_v42, %v907_v59  ;;  %v2586_v60 = vrot.slane %v952_v49, 11  ;;  %2985 = vmatprep.subr.bf16.mxu0 %v3215_v44 }
 0x1a1   : > { %v2569_v62 = vcombine.low %v743_v38, %v743_v38  ;;  %v936_v0 = vor.u32 %v934_v48, %v933_v51  ;;  %v2571_v2 = vcombine.high %v744_v3, %v744_v3  ;;  %v2573_v5 = vcombine.low %v744_v3, %v744_v3  ;;  %v641_v51 = vld [vmem:[#allocation2 + $0x68] sm:$0xf] }
 0x1a2   : > { %v959_v1 = vrot.slane %v957_v53, 7  ;;  %v3855_v9 = vsel %vm3804_vm10, %v2582_v40, %v910_v55  ;;  %v991_v11 = vshrl.u32 %v2567_v61, 16  ;;  %v745_v29 = vrot.slane %v655_v6, 1  ;;  %v3224_v61 = vld [vmem:[#allocation8 + $0xa8] sm:$0xff]   ;;  %v3220_v6 = vld [vmem:[#allocation8 + $0x58] sm:$0xff]  }
 0x1a3   : > { %v996_v12 = vshrl.u32 %v2569_v62, 16  ;;  %v999_v14 = vshll.u32 %v2569_v62, 16  ;;  %v2601_v17 = vcombine.high %v3851_v22, %v3855_v9  ;;  %v2600_v18 = vcombine.low %v3851_v22, %v3855_v9  ;;  %2986 = vmatpush3.bf16.msra.mxu0 %v3215_v44  ;;  %v643_v62 = vld [vmem:[#allocation2 + $0x78] sm:$0xf] }
 0x1a4   : > { %v3863_v19 = vsel %vm3804_vm10, %v2584_v50, %v936_v0  ;;  %v962_v20 = vor.u32 %v960_v54, %v959_v1  ;;  %v2589_v21 = vrot.slane %v991_v11, 11  ;;  %v1017_v24 = vshrl.u32 %v2571_v2, 16  ;;  %2987 = vmatprep.subr.bf16.mxu0 %v3218_v57  ;;  %v638_v50 = vld [vmem:[#allocation2 + $0x50] sm:$0x80] }
 0x1a5   : > { %v998_v23 = vrot.slane %v996_v12, 7  ;;  %v1022_v25 = vshrl.u32 %v2573_v5, 16  ;;  %1414 = vmatprep.mubr.bf16.mxu1 %v2601_v17  ;;  %v1025_v28 = vshll.u32 %v2573_v5, 16  ;;  %v746_v30 = vrot.slane %v656_v16, 1  ;;  %v3219_v5 = vld [vmem:[#allocation8 + $0x10] sm:$0xff]  }
 0x1a6   : > { %v3867_v27 = vsel %vm3804_vm10, %v2586_v60, %v962_v20  ;;  %1415 = vmatmul.mubr.bf16.vlgmr.msra.gmra.mrb[0].mxu1 %v2600_v18  ;;  %v2591_v34 = vrot.slane %v1017_v24, 11  ;;  %v2575_v37 = vcombine.high %v745_v29, %v745_v29  ;;  %v2577_v38 = vcombine.low %v745_v29, %v745_v29  ;;  %v645_v17 = vld [vmem:[#allocation2 + $0x88] sm:$0xf]  ;;  %v3227_v29 = vld [vmem:[#allocation8 + $0xb0] sm:$0xff]  }
 0x1a7   : > { %v2604_v32 = vcombine.high %v3863_v19, %v3867_v27  ;;  %v1001_v33 = vor.u32 %v999_v14, %v998_v23  ;;  %v1024_v35 = vrot.slane %v1022_v25, 7  ;;  %2818 = vmatpush3.bf16.msra.mxu1 %v3213_v8  ;;  %v2595_v39 = vcombine.high %v746_v30, %v746_v30  ;;  %2988 = vmatpush3.bf16.msra.mxu0 %v3218_v57  ;;  %v640_v8 = vld [vmem:[#allocation2 + $0x60] sm:$0x80] }
 0x1a8   : > { %v2597_v40 = vcombine.low %v746_v30, %v746_v30  ;;  %2819 = vmatprep.subr.bf16.mxu1 %v3214_v26  ;;  %v2638_v45 = vcombine.low %v3815_v4, %v3830_v58  ;;  %v694_v47 = vshll.u32 %v3869_v31, 16  ;;  %v1043_v48 = vshrl.u32 %v2575_v37, 16  ;;  %2989 = vmatprep.subr.bf16.mxu0 %v3221_v36 }
 0x1a9   : > { %1422 = vmatprep.mubr.bf16.mxu1 %v2604_v32  ;;  %v3875_v42 = vsel %vm3804_vm10, %v2589_v21, %v1001_v33  ;;  %v1027_v44 = vor.u32 %v1025_v28, %v1024_v35  ;;  %v1048_v59 = vshrl.u32 %v2577_v38, 16  ;;  %v1051_v49 = vshll.u32 %v2577_v38, 16  ;;  %v3222_v32 = vld [vmem:[#allocation8 + $0x18] sm:$0xff]  }
 0x1aa   : > { %v1129_v3 = vshrl.u32 %v2595_v39, 16  ;;  %v1134_v54 = vshrl.u32 %v2597_v40, 16  ;;  %v1137_v55 = vshll.u32 %v2597_v40, 16  ;;  %v2603_v60 = vcombine.low %v3863_v19, %v3867_v27  ;;  %v3223_v40 = vld [vmem:[#allocation8 + $0x60] sm:$0xff]  }
 0x1ab   : > { %v3882_v53 = vsel %vm3804_vm10, %v2591_v34, %v1027_v44  ;;  %v2593_v1 = vrot.slane %v1043_v48, 11  ;;  %v1050_v2 = vrot.slane %v1048_v59, 7  ;;  %2820 = vmatpush3.bf16.msra.mxu1 %v3216_v41  ;;  %v696_v12 = vrot.slane %v694_v47, 1  ;;  %2990 = vmatpush3.bf16.msra.mxu0 %v3221_v36  ;;  %v642_v41 = vld [vmem:[#allocation2 + $0x70] sm:$0x80] }
 0x1ac   : > { %v2608_v0 = vcombine.low %v3875_v42, %v3882_v53  ;;  %v2599_v57 = vrot.slane %v1129_v3, 11  ;;  %v1136_v11 = vrot.slane %v1134_v54, 7  ;;  %2821 = vmatprep.subr.bf16.mxu1 %v3217_v46  ;;  %v697_v14 = vshrl.u32 %v3869_v31, 16  ;;  %2991 = vmatprep.subr.bf16.mxu0 %v3224_v61  ;;  %v644_v54 = vld [vmem:[#allocation2 + $0x80] sm:$0x80] }
 0x1ad   : > { %v701_v16 = vshll.u32 %v641_v51, 16  ;;  %v1053_v18 = vor.u32 %v1051_v49, %v1050_v2  ;;  %v704_v20 = vshrl.u32 %v641_v51, 16  ;;  %v708_v21 = vshll.u32 %v643_v62, 16 }
 0x1ae   : > { %2977 = vmatprep.mubr.bf16.mxu0 %v2608_v0  ;;  %v711_v23 = vshrl.u32 %v643_v62, 16  ;;  %v1139_v24 = vor.u32 %v1137_v55, %v1136_v11  ;;  %1423 = vmatmul.mubr.bf16.gmra.mrb[4].mxu1 %v2603_v60  ;;  %v699_v25 = vor.u32 %v697_v14, %v696_v12  ;;  %v2566_v28 = vcombine.high %v638_v50, %v696_v12  ;;  %v3230_v55 = vld [vmem:[#allocation8 + $0xb8] sm:$0xff]  }
 0x1af   : > { %v703_v26 = vrot.slane %v701_v16, 1  ;;  %v3891_v30 = vsel %vm3804_vm10, %v2593_v1, %v1053_v18  ;;  %2822 = vmatpush3.bf16.msra.mxu1 %v3219_v5  ;;  %v710_v33 = vrot.slane %v708_v21, 1  ;;  %v715_v34 = vshll.u32 %v645_v17, 16  ;;  %2992 = vmatpush3.bf16.msra.mxu0 %v3224_v61  ;;  %v3233_v21 = vld [vmem:[#allocation8 + $0x200] sm:$0xff]  }
 0x1b0   : > { %v718_v35 = vshrl.u32 %v645_v17, 16  ;;  %v3895_v36 = vsel %vm3804_vm10, %v2599_v57, %v1139_v24  ;;  %v2568_v38 = vcombine.low %v3869_v31, %v699_v25  ;;  %2823 = vmatprep.subr.bf16.mxu1 %v3220_v6  ;;  %v978_v46 = vshrl.u32 %v2566_v28, 16  ;;  %2993 = vmatprep.subr.bf16.mxu0 %v3227_v29  ;;  %v3225_v31 = vld [vmem:[#allocation8 + $0x20] sm:$0xff]   ;;  %v3226_v6 = vld [vmem:[#allocation8 + $0x68] sm:$0xff]  }
 0x1b1   : > { %v706_v37 = vor.u32 %v704_v20, %v703_v26  ;;  %v2570_v39 = vcombine.high %v640_v8, %v703_v26  ;;  %v2611_v44 = vcombine.low %v3891_v30, %v3895_v36  ;;  %v713_v47 = vor.u32 %v711_v23, %v710_v33  ;;  %v3229_v26 = vld [vmem:[#allocation8 + $0x70] sm:$0xff]  }
 0x1b2   : > { %v717_v48 = vrot.slane %v715_v34, 1  ;;  %v983_v49 = vshrl.u32 %v2568_v38, 16  ;;  %v986_v3 = vshll.u32 %v2568_v38, 16  ;;  %v2574_v0 = vcombine.high %v642_v41, %v710_v33 }
 0x1b3   : > { %v2572_v59 = vcombine.low %v641_v51, %v706_v37  ;;  %v1004_v50 = vshrl.u32 %v2570_v39, 16  ;;  %2978 = vmatmul.mubr.bf16.gmra.mrb[12].mxu0 %v2611_v44  ;;  %2824 = vmatpush3.bf16.msra.mxu1 %v3222_v32  ;;  %v2576_v1 = vcombine.low %v643_v62, %v713_v47  ;;  %v853_v2 = vshrl.u32 %v3818_v10, 16  ;;  %v3236_v37 = vld [vmem:[#allocation8 + $0x208] sm:$0xff]   ;;  %v3234_v47 = vld [vmem:[#allocation8 + $0x38] sm:$0xff]  }
 0x1b4   : > { %v720_v60 = vor.u32 %v718_v35, %v717_v48  ;;  %2997 = vmatprep.mubr.bf16.mxu0 %v2638_v45  ;;  %v2588_v61 = vrot.slane %v978_v46, 11  ;;  %v985_v51 = vrot.slane %v983_v49, 7  ;;  %2825 = vmatprep.subr.bf16.mxu1 %v3223_v40  ;;  %v1030_v12 = vshrl.u32 %v2574_v0, 16  ;;  %v3228_v45 = vld [vmem:[#allocation8 + $0x28] sm:$0xff]   ;;  %v3232_v40 = vld [vmem:[#allocation8 + $0x78] sm:$0xff]  }
 0x1b5   : > { %v2590_v57 = vrot.slane %v1004_v50, 11  ;;  %v1009_v5 = vshrl.u32 %v2572_v59, 16  ;;  %v1012_v11 = vshll.u32 %v2572_v59, 16  ;;  %v1035_v14 = vshrl.u32 %v2576_v1, 16  ;;  %2994 = vmatpush3.bf16.msra.mxu0 %v3227_v29  ;;  %v3235_v59 = vld [vmem:[#allocation8 + $0x1c0] sm:$0xff]   ;;  %v3242_v50 = vld [vmem:[#allocation8 + $0x218] sm:$0xff]  }
 0x1b6   : > { %v2594_v16 = vcombine.high %v644_v54, %v717_v48  ;;  %v988_v18 = vor.u32 %v986_v3, %v985_v51  ;;  %v1038_v62 = vshll.u32 %v2576_v1, 16  ;;  %v2596_v20 = vcombine.low %v645_v17, %v720_v60  ;;  %2995 = vmatprep.subr.bf16.mxu0 %v3230_v55  ;;  %v3239_v48 = vld [vmem:[#allocation8 + $0x210] sm:$0xff]   ;;  %v657_v60 = vld [vmem:[#allocation2 + $0x98] sm:$0x1f]  ;;  %v3238_v0 = vld [vmem:[#allocation8 + $0x1c8] sm:$0xff]  }
 0x1b7   : > { %v1011_v8 = vrot.slane %v1009_v5, 7  ;;  %2826 = vmatpush3.bf16.msra.mxu1 %v3225_v31  ;;  %v1037_v4 = vrot.slane %v1035_v14, 7  ;;  %v848_v23 = vshrl.u32 %v2546_v15, 16  ;;  %v855_v28 = vrot.slane %v853_v2, 7  ;;  %v3245_v31 = vld [vmem:[#allocation8 + $0x220] sm:$0xff]   ;;  %v3248_v1 = vld [vmem:[#allocation8 + $0x228] sm:$0xff]  }
 0x1b8   : > { %v1116_v58 = vshrl.u32 %v2594_v16, 16  ;;  %v1121_v25 = vshrl.u32 %v2596_v20, 16  ;;  %2827 = vmatprep.subr.bf16.mxu1 %v3226_v6  ;;  %v856_v29 = vshll.u32 %v3818_v10, 16  ;;  %v2641_v17 = vcombine.low %v3834_v7, %v3826_v52  ;;  %v3231_v52 = vld [vmem:[#allocation8 + $0x30] sm:$0xff]   ;;  %v3240_v51 = vld [vmem:[#allocation8 + $0x188] sm:$0xff]   ;;  %v3254_v14 = vld [vmem:[#allocation8 + $0x238] sm:$0xff]  }
 0x1b9   : > { %v1014_v24 = vor.u32 %v1012_v11, %v1011_v8  ;;  %v3912_v32 = vsel %vm3804_vm10, %v2588_v61, %v988_v18  ;;  %v2592_v33 = vrot.slane %v1030_v12, 11  ;;  %v1124_v34 = vshll.u32 %v2596_v20, 16  ;;  %2996 = vmatpush3.bf16.msra.mxu0 %v3230_v55  ;;  %v3241_v5 = vld [vmem:[#allocation8 + $0x1d0] sm:$0xff]   ;;  %v3244_v12 = vld [vmem:[#allocation8 + $0x1d8] sm:$0xff]   ;;  %v3247_v20 = vld [vmem:[#allocation8 + $0x1e0] sm:$0xff]  }
 0x1ba   : > { %v1040_v63 = vor.u32 %v1038_v62, %v1037_v4  ;;  %v2598_v15 = vrot.slane %v1116_v58, 11  ;;  %v1123_v35 = vrot.slane %v1121_v25, 7  ;;  %3005 = vmatprep.subr.bf16.mxu0 %v3233_v21  ;;  %v3922_v7 = vcombine.low %v3839_v13, %v3875_v42  ;;  %v3246_v62 = vld [vmem:[#allocation8 + $0x198] sm:$0xff]  }
 0x1bb   : > { %v3916_v43 = vsel %vm3804_vm10, %v2590_v57, %v1014_v24  ;;  %2828 = vmatpush3.bf16.msra.mxu1 %v3228_v45  ;;  %v2578_v42 = vrot.slane %v848_v23, 11  ;;  %v858_v44 = vor.u32 %v856_v29, %v855_v28  ;;  %v3941_v3 = vcombine.low %v3882_v53, %v3891_v30  ;;  %v3237_v53 = vld [vmem:[#allocation8 + $0x180] sm:$0xff]   ;;  %v3251_v57 = vld [vmem:[#allocation8 + $0x230] sm:$0xff]   ;;  %v3250_v23 = vld [vmem:[#allocation8 + $0x1e8] sm:$0xff]  }
 0x1bc   : > { %v2607_v10 = vcombine.high %v3912_v32, %v3916_v43  ;;  %v2606_v38 = vcombine.low %v3912_v32, %v3916_v43  ;;  %v1126_v39 = vor.u32 %v1124_v34, %v1123_v35  ;;  %2829 = vmatprep.subr.bf16.mxu1 %v3229_v26  ;;  %2998 = vmatmul.mubr.bf16.vlgmr.msra.gmra.mrb[8].mxu0 %v2641_v17  ;;  %v747_v2 = vrot.slane %v657_v60, 1  ;;  %v3252_v29 = vld [vmem:[#allocation8 + $0x1a8] sm:$0xff]   ;;  %v3255_v34 = vld [vmem:[#allocation8 + $0x1b0] sm:$0xff]   ;;  %v3256_v35 = vld [vmem:[#allocation8 + $0x1f8] sm:$0xff]  }
 0x1bd   : > { %3001 = vmatprep.mubr.bf16.mxu0 %v3922_v7  ;;  %v3929_v41 = vsel %vm3804_vm10, %v2592_v33, %v1040_v63  ;;  %3006 = vmatpush3.bf16.msra.mxu0 %v3233_v21  ;;  %v859_v49 = vsel %vm3804_vm10, %v2578_v42, %v858_v44  ;;  %v3950_v61 = vcombine.high %v3855_v9, %v3863_v19 }
 0x1be   : > { %1430 = vmatprep.mubr.bf16.mxu1 %v2607_v10  ;;  %v3933_v13 = vsel %vm3804_vm10, %v2598_v15, %v1126_v39  ;;  %3007 = vmatprep.subr.bf16.mxu0 %v3236_v37  ;;  %v2637_v55 = vcombine.high %v859_v49, %v3851_v22  ;;  %v2636_v30 = vcombine.low %v859_v49, %v3851_v22  ;;  %v3243_v22 = vld [vmem:[#allocation8 + $0x190] sm:$0xff]  }
 0x1bf   : > { %1431 = vmatmul.mubr.bf16.gmra.mrb[8].mxu1 %v2606_v38  ;;  %v2610_v46 = vcombine.high %v3929_v41, %v3933_v13  ;;  %v2609_v54 = vcombine.low %v3929_v41, %v3933_v13  ;;  %v2675_v6 = vcombine.low %v747_v2, %v747_v2  ;;  %v2639_v11 = vcombine.low %v3855_v9, %v3863_v19  ;;  %v3249_v9 = vld [vmem:[#allocation8 + $0x1a0] sm:$0xff]   ;;  %v647_v19 = vld [vmem:[#allocation2 + $0x98] sm:$0xf]  ;;  %v3260_v49 = vld [vmem:[#allocation9 + $0x10] sm:$0xff]  }
 0x1c0   : > { %2830 = vmatpush3.bf16.msra.mxu1 %v3231_v52  ;;  %v2673_v16 = vcombine.high %v747_v2, %v747_v2  ;;  %v2643_v8 = vcombine.high %v3867_v27, %v3912_v32  ;;  %v2642_v45 = vcombine.low %v3867_v27, %v3912_v32  ;;  %v2646_v26 = vcombine.high %v3916_v43, %v3929_v41  ;;  %v3257_v52 = vld [vmem:[#allocation8 + $0x1b8] sm:$0xff]  }
 0x1c1   : > { %2831 = vmatprep.subr.bf16.mxu1 %v3232_v40  ;;  %1438 = vmatprep.mubr.bf16.mxu1 %v2610_v46  ;;  %v1844_v18 = vshrl.u32 %v2675_v6, 16  ;;  %v1847_v58 = vshll.u32 %v2675_v6, 16  ;;  %v722_v28 = vshll.u32 %v647_v19, 16  ;;  %v725_v33 = vshrl.u32 %v647_v19, 16 }
 0x1c2   : > { %3008 = vmatpush3.bf16.msra.mxu0 %v3236_v37  ;;  %v1839_v21 = vshrl.u32 %v2673_v16, 16  ;;  %v2645_v15 = vcombine.low %v3916_v43, %v3929_v41  ;;  %v646_v37 = vld [vmem:[#allocation2 + $0x90] sm:$0x80] }
 0x1c3   : > { %3009 = vmatprep.subr.bf16.mxu0 %v3239_v48  ;;  %v1846_v4 = vrot.slane %v1844_v18, 7  ;;  %v724_v32 = vrot.slane %v722_v28, 1 }
 0x1c4   : > { %2832 = vmatpush3.bf16.msra.mxu1 %v3234_v47  ;;  %3002 = vmatmul.mubr.bf16.gmra.mrb[12].mxu0 %v3941_v3  ;;  %v2677_v24 = vrot.slane %v1839_v21, 11 }
 0x1c5   : > { %2869 = vmatprep.subr.bf16.mxu1 %v3235_v59  ;;  %3021 = vmatprep.mubr.bf16.mxu0 %v2641_v17  ;;  %v1849_v25 = vor.u32 %v1847_v58, %v1846_v4  ;;  %v3253_v17 = vld [vmem:[#allocation8 + $0x1f0] sm:$0xff]   ;;  %v727_v10 = vor.u32 %v725_v33, %v724_v32  ;;  %v2672_v38 = vcombine.high %v646_v37, %v724_v32  ;;  %v3259_v59 = vld [vmem:[#allocation9 + $0x8] sm:$0xff]  }
 0x1c6   : > { %3010 = vmatpush3.bf16.msra.mxu0 %v3239_v48  ;;  %v3258_v48 = vld [vmem:[#allocation9] sm:$0xff]  }
 0x1c7   : > { %1439 = vmatmul.mubr.bf16.gmra.mrb[12].mxu1 %v2609_v54  ;;  %3011 = vmatprep.subr.bf16.mxu0 %v3242_v50  ;;  %v1850_v27 = vsel %vm3804_vm10, %v2677_v24, %v1849_v25  ;;  %v3264_v54 = vld [vmem:[#allocation9 + $0x30] sm:$0xff]  }
 0x1c8   : > { %1715 = vmatprep.mubr.bf16.mxu1 %v2637_v55  ;;  %v2680_v63 = vcombine.low %v3895_v36, %v1850_v27  ;;  %v1826_v36 = vshrl.u32 %v2672_v38, 16 }
 0x1ca   : > { %3012 = vmatpush3.bf16.msra.mxu0 %v3242_v50  ;;  %v2676_v43 = vrot.slane %v1826_v36, 11  ;;  %v3262_v50 = vld [vmem:[#allocation9 + $0x20] sm:$0xff]  }
 0x1cb   : > { %3013 = vmatprep.subr.bf16.mxu0 %v3245_v31 }
 0x1ce   : > { %3014 = vmatpush3.bf16.msra.mxu0 %v3245_v31 }
 0x1cf   : > { %1716 = vmatmul.mubr.bf16.vlgmr.msra.gmra.mrb[16].mxu1 %v2636_v30  ;;  %3015 = vmatprep.subr.bf16.mxu0 %v3248_v1 }
 0x1d0   : > { %2870 = vmatpush3.bf16.msra.mxu1 %v3237_v53  ;;  %1723 = vmatprep.mubr.bf16.mxu1 %v3950_v61 }
 0x1d1   : > { %2871 = vmatprep.subr.bf16.mxu1 %v3238_v0 }
 0x1d2   : > { %3016 = vmatpush3.bf16.msra.mxu0 %v3248_v1 }
 0x1d3   : > { %3017 = vmatprep.subr.bf16.mxu0 %v3251_v57 }
 0x1d4   : > { %2872 = vmatpush3.bf16.msra.mxu1 %v3240_v51 }
 0x1d5   : > { %2873 = vmatprep.subr.bf16.mxu1 %v3241_v5 }
 0x1d6   : > { %3018 = vmatpush3.bf16.msra.mxu0 %v3251_v57 }
 0x1d7   : > { %1724 = vmatmul.mubr.bf16.gmra.mrb[20].mxu1 %v2639_v11  ;;  %3019 = vmatprep.subr.bf16.mxu0 %v3254_v14 }
 0x1d8   : > { %2874 = vmatpush3.bf16.msra.mxu1 %v3243_v22  ;;  %1731 = vmatprep.mubr.bf16.mxu1 %v2643_v8 }
 0x1d9   : > { %2875 = vmatprep.subr.bf16.mxu1 %v3244_v12 }
 0x1da   : > { %3020 = vmatpush3.bf16.msra.mxu0 %v3254_v14 }
 0x1dc   : > { %2876 = vmatpush3.bf16.msra.mxu1 %v3246_v62 }
 0x1dd   : > { %2877 = vmatprep.subr.bf16.mxu1 %v3247_v20  ;;  %3022 = vmatmul.mubr.bf16.vlgmr.msra.gmra.mrb[8].mxu0 %v3922_v7  ;;  %v2674_v7 = vcombine.low %v647_v19, %v727_v10 }
 0x1de   : > { %3025 = vmatprep.mubr.bf16.mxu0 %v3941_v3  ;;  %v3261_v3 = vld [vmem:[#allocation9 + $0x18] sm:$0xff]  }
 0x1df   : > { %1732 = vmatmul.mubr.bf16.gmra.mrb[24].mxu1 %v2642_v45  ;;  %v1831_v39 = vshrl.u32 %v2674_v7, 16  ;;  %v1834_v42 = vshll.u32 %v2674_v7, 16 }
 0x1e0   : > { %2878 = vmatpush3.bf16.msra.mxu1 %v3249_v9  ;;  %1739 = vmatprep.mubr.bf16.mxu1 %v2646_v26 }
 0x1e1   : > { %2879 = vmatprep.subr.bf16.mxu1 %v3250_v23  ;;  %v1833_v40 = vrot.slane %v1831_v39, 7 }
 0x1e3   : > { %v1836_v41 = vor.u32 %v1834_v42, %v1833_v40 }
 0x1e4   : > { %2880 = vmatpush3.bf16.msra.mxu1 %v3252_v29 }
 0x1e5   : > { %2881 = vmatprep.subr.bf16.mxu1 %v3253_v17  ;;  %3026 = vmatmul.mubr.bf16.gmra.mrb[12].mxu0 %v2680_v63  ;;  %v1837_v44 = vsel %vm3804_vm10, %v2676_v43, %v1836_v41 }
 0x1e6   : > { %v2679_v46 = vcombine.high %v3933_v13, %v1837_v44  ;;  %v2678_v47 = vcombine.low %v3933_v13, %v1837_v44  ;;  %v3265_v13 = vld [vmem:[#allocation9 + $0x38] sm:$0xff]  }
 0x1e7   : > { %1740 = vmatmul.mubr.bf16.gmra.mrb[28].mxu1 %v2645_v15 }
 0x1e8   : > { %2882 = vmatpush3.bf16.msra.mxu1 %v3255_v34  ;;  %2085 = vmatprep.mubr.bf16.mxu1 %v3950_v61 }
 0x1e9   : > { %2883 = vmatprep.subr.bf16.mxu1 %v3256_v35 }
 0x1ec   : > { %2884 = vmatpush3.bf16.msra.mxu1 %v3257_v52 }
 0x1ed   : > { %3029 = vmatprep.subr.bf16.mxu1 %v3258_v48 }
 0x1ef   : > { %2086 = vmatmul.mubr.bf16.vlgmr.msra.gmra.mrb[32].mxu1 %v2639_v11 }
 0x1f0   : > { %2093 = vmatprep.mubr.bf16.mxu1 %v2643_v8  ;;  %3030 = vmatpush3.bf16.msra.mxu1 %v3258_v48 }
 0x1f1   : > { %3031 = vmatprep.subr.bf16.mxu1 %v3259_v59 }
 0x1f4   : > { %3032 = vmatpush3.bf16.msra.mxu1 %v3259_v59 }
 0x1f5   : > { %3033 = vmatprep.subr.bf16.mxu1 %v3260_v49 }
 0x1f7   : > { %2094 = vmatmul.mubr.bf16.gmra.mrb[36].mxu1 %v2642_v45 }
 0x1f8   : > { %2101 = vmatprep.mubr.bf16.mxu1 %v2646_v26  ;;  %3034 = vmatpush3.bf16.msra.mxu1 %v3260_v49 }
 0x1f9   : > { %3035 = vmatprep.subr.bf16.mxu1 %v3261_v3 }
 0x1fc   : > { %3036 = vmatpush3.bf16.msra.mxu1 %v3261_v3 }
 0x1fd   : > { %3037 = vmatprep.subr.bf16.mxu1 %v3262_v50 }
 0x1ff   : > { %2102 = vmatmul.mubr.bf16.gmra.mrb[40].mxu1 %v2645_v15 }
 0x200   : > { %2109 = vmatprep.mubr.bf16.mxu1 %v2679_v46  ;;  %3038 = vmatpush3.bf16.msra.mxu1 %v3262_v50 }
 0x201   : > { %3039 = vmatprep.subr.bf16.mxu1 %v3263_v56 }
 0x204   : > { %3040 = vmatpush3.bf16.msra.mxu1 %v3263_v56 }
 0x205   : > { %3041 = vmatprep.subr.bf16.mxu1 %v3264_v54 }
 0x207   : > { %2110 = vmatmul.mubr.bf16.gmra.mrb[44].mxu1 %v2678_v47 }
 0x208   : > { %3042 = vmatpush3.bf16.msra.mxu1 %v3264_v54 }
 0x209   : > { %3043 = vmatprep.subr.bf16.mxu1 %v3265_v13 }
 0x20c   : > { %3044 = vmatpush3.bf16.msra.mxu1 %v3265_v13 }
 0x279   : > { %v2781_v55 = vpop.f32.mrb[0].mxu1 }
 0x27a   : > { %v2782_v31 = vpop.f32.mrb[1].mxu1 }
 0x27b   : > { %v2783_v60 = vadd.f32 %v2782_v31, %v2781_v55  ;;  %v2784_v53 = vpop.f32.mrb[2].mxu1 }
 0x27c   : > { %v2785_v30 = vpop.f32.mrb[3].mxu1 }
 0x27d   : > { %v2786_v0 = vadd.f32 %v2785_v30, %v2784_v53 }
 0x281   : > { %v2787_v1 = vpop.f32.mrb[4].mxu1 }
 0x282   : > { %v2788_v2 = vpop.f32.mrb[5].mxu1 }
 0x283   : > { %v2789_v61 = vadd.f32 %v2788_v2, %v2787_v1  ;;  %v2790_v51 = vpop.f32.mrb[6].mxu1  ;;  %v2705_v2 = vld [vmem:[%s4052_s4] ss:$0 sm:$0xff] }
 0x284   : > { %v2791_v57 = vpop.f32.mrb[7].mxu1 }
 0x285   : > { %v2792_v5 = vadd.f32 %v2791_v57, %v2790_v51 }
 0x292   : > { %v2793_v6 = vpop.f32.mrb[8].mxu1 }
 0x293   : > { %v2794_v22 = vpop.f32.mrb[9].mxu1 }
 0x294   : > { %v2795_v11 = vadd.f32 %v2794_v22, %v2793_v6  ;;  %v2796_v12 = vpop.f32.mrb[10].mxu1 }
 0x295   : > { %v2797_v14 = vpop.f32.mrb[11].mxu1 }
 0x296   : > { %v2798_v16 = vadd.f32 %v2797_v14, %v2796_v12 }
 0x29a   : > { %v2799_v18 = vpop.f32.mrb[12].mxu1 }
 0x29b   : > { %v2800_v8 = vpop.f32.mrb[13].mxu1 }
 0x29c   : > { %v2801_v62 = vadd.f32 %v2800_v8, %v2799_v18  ;;  %v2802_v20 = vpop.f32.mrb[14].mxu1 }
 0x29d   : > { %v2803_v21 = vpop.f32.mrb[15].mxu1 }
 0x29e   : > { %v2804_v4 = vadd.f32 %v2803_v21, %v2802_v20 }
 0x2a2   : > { %v2833_v58 = vpop.f32.mrb[16].mxu1 }
 0x2a3   : > { %v2834_v9 = vpop.f32.mrb[17].mxu1 }
 0x2a4   : > { %v2835_v19 = vadd.f32 %v2834_v9, %v2833_v58  ;;  %v2836_v45 = vpop.f32.mrb[18].mxu1 }
 0x2a5   : > { %v2837_v23 = vpop.f32.mrb[19].mxu1 }
 0x2a6   : > { %v3056_v24 = vadd.f32 %v2835_v19, %v2783_v60  ;;  %v2838_v25 = vadd.f32 %v2837_v23, %v2836_v45 }
 0x2a8   : > { %v3062_v26 = vadd.f32 %v2838_v25, %v2786_v0 }
 0x2aa   : > { %v2839_v28 = vpop.f32.mrb[20].mxu1 }
 0x2ab   : > { %v2840_v29 = vpop.f32.mrb[21].mxu1 }
 0x2ac   : > { %v2841_v17 = vadd.f32 %v2840_v29, %v2839_v28  ;;  %v2842_v27 = vpop.f32.mrb[22].mxu1 }
 0x2ad   : > { %v2843_v32 = vpop.f32.mrb[23].mxu1 }
 0x2ae   : > { %v3053_v33 = vadd.f32 %v2841_v17, %v2789_v61  ;;  %v2844_v34 = vadd.f32 %v2843_v32, %v2842_v27 }
 0x2b0   : > { %v3059_v63 = vadd.f32 %v2844_v34, %v2792_v5  ;;  %v3023_v15 = vpop.f32.mrb[8].mxu0 }
 0x2b1   : > { %v2152_v10 = vpop.f32.mrb[9].mxu0 }
 0x2b2   : > { %v2845_v35 = vpop.f32.mrb[24].mxu1  ;;  %v3024_v7 = vpop.f32.mrb[10].mxu0 }
 0x2b3   : > { %v2846_v52 = vpop.f32.mrb[25].mxu1  ;;  %v2155_v39 = vpop.f32.mrb[11].mxu0 }
 0x2b4   : > { %v2847_v37 = vadd.f32 %v2846_v52, %v2845_v35  ;;  %v2848_v38 = vpop.f32.mrb[26].mxu1 }
 0x2b5   : > { %v2849_v36 = vpop.f32.mrb[27].mxu1 }
 0x2b6   : > { %v3068_v40 = vadd.f32 %v2847_v37, %v2795_v11  ;;  %v2850_v42 = vadd.f32 %v2849_v36, %v2848_v38 }
 0x2b8   : > { %v3074_v43 = vadd.f32 %v2850_v42, %v2798_v16  ;;  %v3973_v41 = vpop.f32.mrb[12].mxu0 }
 0x2b9   : > { %v2168_v46 = vpop.f32.mrb[13].mxu0 }
 0x2ba   : > { %v2851_v44 = vpop.f32.mrb[28].mxu1  ;;  %v3975_v48 = vpop.f32.mrb[14].mxu0 }
 0x2bb   : > { %v2852_v47 = vpop.f32.mrb[29].mxu1  ;;  %v2171_v3 = vpop.f32.mrb[15].mxu0 }
 0x2bc   : > { %v2853_v59 = vadd.f32 %v2852_v47, %v2851_v44  ;;  %v2854_v49 = vpop.f32.mrb[30].mxu1 }
 0x2bd   : > { %v2855_v50 = vpop.f32.mrb[31].mxu1 }
 0x2be   : > { %v3065_v56 = vadd.f32 %v2853_v59, %v2801_v62  ;;  %v2856_v54 = vadd.f32 %v2855_v50, %v2854_v49 }
 0x2c0   : > { %v3071_v13 = vadd.f32 %v2856_v54, %v2804_v4 }
 0x2c2   : > { %v2885_v55 = vpop.f32.mrb[32].mxu1 }
 0x2c3   : > { %v2886_v31 = vpop.f32.mrb[33].mxu1 }
 0x2c4   : > { %v2887_v60 = vadd.f32 %v2886_v31, %v2885_v55  ;;  %v2888_v53 = vpop.f32.mrb[34].mxu1  ;;  %v3270_v31 = vld [vmem:[%s3724_s8 + $0x8] sm:$0xff]  }
 0x2c5   : > { %v2889_v30 = vpop.f32.mrb[35].mxu1 }
 0x2c6   : > { %v3057_v0 = vadd.f32 %v3056_v24, %v2887_v60  ;;  %v2890_v1 = vadd.f32 %v2889_v30, %v2888_v53  ;;  %v2356_v60 = vunpack.c.l.bf16 %v3270_v31  ;;  %v3271_v53 = vld [vmem:[%s3724_s8] sm:$0xff]  }
 0x2c7   : > { %v2354_v30 = vunpack.c.l.bf16 %v3271_v53 }
 0x2c8   : > { %v3058_v61 = vadd.f32 %v3057_v0, %v2152_v10  ;;  %v3063_v51 = vadd.f32 %v3062_v26, %v2890_v1  ;;  %v2357_v1 = vunpack.c.h.bf16 %v3270_v31 }
 0x2ca   : > { %v3064_v57 = vadd.f32 %v3063_v51, %v2155_v39  ;;  %v2891_v5 = vpop.f32.mrb[36].mxu1  ;;  %v2198_v6 = vadd.f32 %v3058_v61, %v2705_v2 }
 0x2cb   : > { %v2892_v22 = vpop.f32.mrb[37].mxu1 }
 0x2cc   : > { %v2893_v11 = vadd.f32 %v2892_v22, %v2891_v5  ;;  %v2894_v12 = vpop.f32.mrb[38].mxu1  ;;  %v2199_v14 = vadd.f32 %v3064_v57, %v2705_v2  ;;  %v2206_v62 = vmax.f32 %v2198_v6, 0.0 }
 0x2cd   : > { %v2895_v16 = vpop.f32.mrb[39].mxu1 }
 0x2ce   : > { %v3054_v18 = vadd.f32 %v3053_v33, %v2893_v11  ;;  %v2896_v8 = vadd.f32 %v2895_v16, %v2894_v12  ;;  %v2207_v20 = vmax.f32 %v2199_v14, 0.0 }
 0x2d0   : > { %v3055_v21 = vadd.f32 %v3054_v18, %v3023_v15  ;;  %v3060_v4 = vadd.f32 %v3059_v63, %v2896_v8  ;;  %v2214_v58 = vpack.c.bf16 %v2207_v20, %v2206_v62 }
 0x2d2   : > { %v2200_v9 = vadd.f32 %v3055_v21, %v2705_v2  ;;  %v3061_v19 = vadd.f32 %v3060_v4, %v3024_v7  ;;  %v2897_v45 = vpop.f32.mrb[40].mxu1  ;;  %3045 = vmatprep.mubr.bf16.mxu1 %v2214_v58  ;;  %v3272_v21 = vld [vmem:[%s3724_s8 + $0x18] sm:$0xff]  }
 0x2d3   : > { %v2898_v23 = vpop.f32.mrb[41].mxu1  ;;  %v2360_v4 = vunpack.c.l.bf16 %v3272_v21 }
 0x2d4   : > { %v2201_v24 = vadd.f32 %v3061_v19, %v2705_v2  ;;  %v2899_v25 = vadd.f32 %v2898_v23, %v2897_v45  ;;  %v2900_v26 = vpop.f32.mrb[42].mxu1  ;;  %v2208_v29 = vmax.f32 %v2200_v9, 0.0  ;;  %v3273_v9 = vld [vmem:[%s3724_s8 + $0x10] sm:$0xff]   ;;  %s3470_s8 = smov [#allocation11]  }
 0x2d5   : > { %v2901_v28 = vpop.f32.mrb[43].mxu1  ;;  %v2358_v19 = vunpack.c.l.bf16 %v3273_v9  ;;  %s3392_s30 = sshll.u32 %s3470_s8, 4  ;;  %s3393_s30 = int_to_ptr.vmem [resolvable:$false] %s3392_s30 }
 0x2d6   : > { %v2209_v17 = vmax.f32 %v2201_v24, 0.0  ;;  %v3069_v27 = vadd.f32 %v3068_v40, %v2899_v25  ;;  %v2902_v32 = vadd.f32 %v2901_v28, %v2900_v26  ;;  %v2361_v24 = vunpack.c.h.bf16 %v3272_v21  ;;  %s3394_s9 = scalar_lea.vmem %s3393_s30, 1024  ;;  %p3395_p12 = scmp.lt.s32.totalorder %s3997_s20, %s3393_s30 }
 0x2d7   : > { %v2359_v28 = vunpack.c.h.bf16 %v3273_v9  ;;  %p3396_p1 = scmp.lt.s32.totalorder %s3394_s9, %s3388_s28 }
 0x2d8   : > { %v2215_v33 = vpack.c.bf16 %v2209_v17, %v2208_v29  ;;  %v3070_v34 = vadd.f32 %v3069_v27, %v2168_v46  ;;  %v3075_v35 = vadd.f32 %v3074_v43, %v2902_v32 }
 0x2d9   : > { %p3397_p2 = por %p3396_p1, %p3395_p12 }
 0x2da   : > { %v3076_v10 = vadd.f32 %v3075_v35, %v2171_v3  ;;  %v2903_v15 = vpop.f32.mrb[44].mxu1  ;;  %3046 = vmatmul.mubr.bf16.vlgmr.msra.gmra.mrb[48].mxu1 %v2215_v33  ;;  %v2202_v63 = vadd.f32 %v3070_v34, %v2705_v2 }
 0x2db   : > { %v2904_v52 = vpop.f32.mrb[45].mxu1  ;;  %p3398_p4 = pnand %p3397_p2, %p3391_p7 }
 0x2dc   : > { %v2905_v7 = vadd.f32 %v2904_v52, %v2903_v15  ;;  %v2906_v37 = vpop.f32.mrb[46].mxu1  ;;  %v2203_v38 = vadd.f32 %v3076_v10, %v2705_v2  ;;  %v2210_v44 = vmax.f32 %v2202_v63, 0.0 }
 0x2dd   : > { %v2907_v39 = vpop.f32.mrb[47].mxu1 }
 0x2de   : > { %v3066_v36 = vadd.f32 %v3065_v56, %v2905_v7  ;;  %v2908_v42 = vadd.f32 %v2907_v39, %v2906_v37  ;;  %v2211_v47 = vmax.f32 %v2203_v38, 0.0  ;;  %v2706_v56 = vld [vmem:[%s4054_s6] ss:$0 sm:$0xff] }
 0x2e0   : > { %v3067_v40 = vadd.f32 %v3066_v36, %v3973_v41  ;;  %v3072_v59 = vadd.f32 %v3071_v13, %v2908_v42  ;;  %v2216_v46 = vpack.c.bf16 %v2211_v47, %v2210_v44 }
 0x2e2   : > { %v3073_v43 = vadd.f32 %v3072_v59, %v3975_v48  ;;  %3049 = vmatprep.mubr.bf16.mxu1 %v2216_v46  ;;  %v2204_v49 = vadd.f32 %v3067_v40, %v2705_v2  ;;  %v2355_v48 = vunpack.c.h.bf16 %v3271_v53 }
 0x2e4   : > { %v2205_v3 = vadd.f32 %v3073_v43, %v2705_v2  ;;  %v2212_v50 = vmax.f32 %v2204_v49, 0.0 }
 0x2e6   : > { %v2213_v54 = vmax.f32 %v2205_v3, 0.0 }
 0x2e8   : > { %v2217_v55 = vpack.c.bf16 %v2213_v54, %v2212_v50 }
 0x2ea   : > { %3050 = vmatmul.mubr.bf16.gmra.mrb[52].mxu1 %v2217_v55 }
 0x3ad   : > { %v3047_v41 = vpop.f32.mrb[48].mxu1 }
 0x3ae   : > { %v2332_v13 = vadd.f32 %v3047_v41, %v2706_v56  ;;  %v2323_v0 = vpop.f32.mrb[49].mxu1 }
 0x3af   : > { %v2324_v61 = vadd.f32 %v2706_v56, %v2323_v0  ;;  %v3048_v2 = vpop.f32.mrb[50].mxu1 }
 0x3b0   : > { %v2364_v51 = vadd.f32 %v2356_v60, %v2332_v13  ;;  %v2335_v57 = vadd.f32 %v3048_v2, %v2706_v56  ;;  %v2326_v5 = vpop.f32.mrb[51].mxu1 }
 0x3b1   : > { %v2362_v6 = vadd.f32 %v2354_v30, %v2324_v61  ;;  %v2327_v22 = vadd.f32 %v2706_v56, %v2326_v5 }
 0x3b2   : > { %v2365_v11 = vadd.f32 %v2357_v1, %v2335_v57  ;;  %v2372_v14 = vmax.f32 %v2364_v51, 0.0 }
 0x3b3   : > { %v2363_v12 = vadd.f32 %v2355_v48, %v2327_v22  ;;  %v2370_v18 = vmax.f32 %v2362_v6, 0.0 }
 0x3b4   : > { %v2373_v16 = vmax.f32 %v2365_v11, 0.0 }
 0x3b5   : > { %v2371_v8 = vmax.f32 %v2363_v12, 0.0 }
 0x3b6   : > { %v2738_v62 = vpack.c.bf16 %v2373_v16, %v2372_v14 }
 0x3b7   : > { %v2733_v20 = vpack.c.bf16 %v2371_v8, %v2370_v18 }
 0x3b8   : > { %2750 = vst [vmem:[%s3989_s12 + $0x8] sm:$0xff] %v2738_v62  }
 0x3b9   : > { %2734 = vst [vmem:[%s3989_s12] sm:$0xff] %v2733_v20  }
 0x3bd   : > { %v3051_v58 = vpop.f32.mrb[52].mxu1 }
 0x3be   : > { %v2348_v45 = vadd.f32 %v3051_v58, %v2706_v56  ;;  %v2339_v23 = vpop.f32.mrb[53].mxu1 }
 0x3bf   : > { %v2340_v25 = vadd.f32 %v2706_v56, %v2339_v23  ;;  %v3052_v26 = vpop.f32.mrb[54].mxu1 }
 0x3c0   : > { %v2368_v29 = vadd.f32 %v2360_v4, %v2348_v45  ;;  %v2351_v17 = vadd.f32 %v3052_v26, %v2706_v56  ;;  %v2342_v27 = vpop.f32.mrb[55].mxu1 }
 0x3c1   : > { %v2366_v32 = vadd.f32 %v2358_v19, %v2340_v25  ;;  %v2343_v33 = vadd.f32 %v2706_v56, %v2342_v27 }
 0x3c2   : > { %v2369_v34 = vadd.f32 %v2361_v24, %v2351_v17  ;;  %v2376_v10 = vmax.f32 %v2368_v29, 0.0 }
 0x3c3   : > { %v2367_v35 = vadd.f32 %v2359_v28, %v2343_v33  ;;  %v2374_v63 = vmax.f32 %v2366_v32, 0.0 }
 0x3c4   : > { %v2377_v15 = vmax.f32 %v2369_v34, 0.0 }
 0x3c5   : > { %v2375_v52 = vmax.f32 %v2367_v35, 0.0 }
 0x3c6   : > { %v2748_v7 = vpack.c.bf16 %v2377_v15, %v2376_v10 }
 0x3c7   : > { %v2743_v37 = vpack.c.bf16 %v2375_v52, %v2374_v63 }
 0x3c8   : > { %2752 = vst [vmem:[%s3989_s12 + $0x18] sm:$0xff] %v2748_v7  }
 0x3c9   : > { %2751 = vst [vmem:[%s3989_s12 + $0x10] sm:$0xff] %v2743_v37  }
 0x3ca   : > { %3401 = shalt.err (!%p3398_p4)
}
 0x3cb   : > { %s3402_s13 = scalar_lea.hbm %s4002_s23, 512  ;;  %s3406_s14 = scalar_lea.hbm %s4055_s7, 1024 }
 0x3cc   : > { %p3403_p9 = scmp.ne.s32.totalorder %s4002_s23, %s3402_s13  ;;  %p3407_p8 = scmp.lt.u32.totalorder %s4002_s23, %s4055_s7 }
 0x3cd   : > { %p3408_p13 = scmp.lt.u32.totalorder %s3406_s14, %s3402_s13  ;;  %p3410_p10 = scmp.lt.u32.totalorder %s3402_s13, %s4002_s23 }
 0x3ce   : > { %p3404_p0 = pnand %p3403_p9, %p3667_p5 }
 0x3cf   : > { %p3409_p6 = por %p3408_p13, %p3407_p8 }
 0x3d0   : > { %p3405_p11 = pneg %p3404_p0 }
 0x3d1   : > { %p3411_p3 = por %p3410_p10, %p3409_p6 }
 0x3d3   : > { %p3412_p7 = pnand %p3411_p3, %p3405_p11 }
 0x3d5   : > { %3415 = shalt.err (!%p3412_p7)
}
 0x3d6   : > { %s3471_s16 = smov 64   ;;  %s3472_s29 = smov 4  }
 0x3d7   : > { %3107 = dma.vmem_to_hbm [thread:$0]  (%p3667_p5), %s3997_s20, 512, %s4002_s23, %s2395_s11, %s3471_s16, %s3471_s16, %s3472_s29  }
 0x3d8 PF: > { %s4083_s28 = sld [smem:[#allocation16_spill]]  ;;  %s2423_s8 = sand.u32 1, %s3450_s24  }
 0x3d9   : > { %p4085_p1 = scmp.ge.s32.totalorder %s3462_s27, 2  ;;  %s2424_s30 = scalar_lea.sflag [#allocation5], %s2423_s8 }
 0x3de   : > { %p4084_p12 = scmp.ne.s32.totalorder %s4083_s28, 0 }
 0x3e0   : > { %p3124_p2 = pnand %p4085_p1, %p4084_p12 }
 0x3e2   : > { %3445 = dma.done.wait (!%p3124_p2), %s2424_s30, 512  }
 0x3e3   : > { %3447 = vsyncadd (!%p3124_p2), %s2424_s30, 4294966784  ;;  %p22_p4 = scmp.ge.s32.totalorder %s3653_s22, 4   ;;  %s4086_s24 = smov %s3454_s25 }
 0x3e4   : > { %s4087_s25 = smov %s3458_s26  ;;  %s4088_s26 = smov %s3663_s18 }
 0x3e5   : > { %s4089_s27 = smov %s3653_s22  ;;  %24 = sbr.rel (!%p22_p4) target bundleno = 7 (0x7), region = 109 }
 0x3ec   :  { %2429 = vsyncpa [#allocation4], 1 }
 0x3ed   :  { %2431 = vsyncpa [#allocation4 + $0x1], 1 }
 0x3ee   :  { %2432 = vsyncpa [#allocation7], 1 }
 0x3ef   :  { %2433 = vsyncpa [#allocation10], 1 }
 0x3f0   :  { %2434 = vsyncpa [#allocation5], 1 }
 0x3f1   :  { %2436 = vsyncpa [#allocation5 + $0x1], 1 }

</bundles_post_ra>
